<compile_context>
chip_gen: v7x
topology: tpu7x:2x2x1
jax: 0.10.0
libtpu: 0.0.40
codegen_flags: <defaults>
</compile_context>

<pallas_src>
import jax
import jax.numpy as jnp
from jax.experimental import pallas as pl
from jax.experimental.pallas import tpu as pltpu

INPUT_SIZE = 34
HIDDEN = 128
NUM_CLASSES = 2
LANE = 128


def _round_up(x, m):
    return (x + m - 1) // m * m


def _reorder_ifgo_to_ifog(w):
    """Permute the trailing 4H axis from PyTorch gate order [i,f,g,o] to [i,f,o,g]."""
    H = HIDDEN
    return jnp.concatenate(
        [w[..., :2 * H], w[..., 3 * H:4 * H], w[..., 2 * H:3 * H]], axis=-1)


def prepare_params(w_ih, w_hh, b_ih, b_hh, w_fc, b_fc):
    """One-time conversion of PyTorch-layout params to kernel layout.

    PyTorch shapes: w_ih (4H, F), w_hh (4H, H), b_ih (4H,), b_hh (4H,),
                    w_fc (2, H), b_fc (2,).
    """
    w_ih_t = _reorder_ifgo_to_ifog(w_ih.T).astype(jnp.float32)   # (F, 4H)
    w_hh_t = _reorder_ifgo_to_ifog(w_hh.T).astype(jnp.bfloat16)  # (H, 4H) bf16 MXU
    b = _reorder_ifgo_to_ifog(b_ih + b_hh).astype(jnp.float32)   # (4H,)
    # softmax(logits)[:, 1] == sigmoid(l1 - l0): fold fc + softmax into one
    # sigmoid over a weight-difference vector.
    w_prob = (w_fc[1] - w_fc[0]).reshape(1, HIDDEN).astype(jnp.float32)  # (1, H)
    b_prob = (b_fc[1] - b_fc[0]).reshape(1, 1).astype(jnp.float32)       # (1, 1)
    return dict(w_ih=w_ih_t, w_hh=w_hh_t, b=b, w_prob=w_prob, b_prob=b_prob)


def _make_kernel(t_chunk, rem):
    """Build the recurrence kernel for a given (static) chunk length / tail."""
    H = HIDDEN

    def kernel(gx_ref, whh_ref, wp_ref, bp_ref, prob_ref, h_ref, c_ref):
        tc = pl.program_id(1)
        n_tc = pl.num_programs(1)

        # Reset recurrent state at the start of every batch block.
        @pl.when(tc == 0)
        def _():
            h_ref[...] = jnp.zeros_like(h_ref)
            c_ref[...] = jnp.zeros_like(c_ref)

        if rem:
            # Only the last time chunk is ragged; mask its padded steps.
            valid_steps = jnp.where(tc == n_tc - 1, rem, t_chunk)

        def step(t, carry):
            h, c = carry
            # Input projection was precomputed (gx = x @ W_ih^T + b, bf16);
            # only the recurrent matmul remains on the serial path.
            gates = (gx_ref[t].astype(jnp.float32)
                     + jnp.dot(h.astype(jnp.bfloat16), whh_ref[...],
                               preferred_element_type=jnp.float32))
            # Gate order [i, f, o, g]: one contiguous sigmoid over 3H, one tanh.
            sig = jax.nn.sigmoid(gates[:, :3 * H])
            i_g = sig[:, 0 * H:1 * H]
            f_g = sig[:, 1 * H:2 * H]
            o_g = sig[:, 2 * H:3 * H]
            g_g = jnp.tanh(gates[:, 3 * H:4 * H])
            c_new = f_g * c + i_g * g_g          # f32 cell state
            h_new = o_g * jnp.tanh(c_new)        # f32 hidden state
            if rem:
                keep = t < valid_steps
                h_new = jnp.where(keep, h_new, h)
                c_new = jnp.where(keep, c_new, c)
            return h_new, c_new

        h, c = jax.lax.fori_loop(0, t_chunk, step, (h_ref[...], c_ref[...]),
                                 unroll=min(8, t_chunk))
        h_ref[...] = h
        c_ref[...] = c

        # Epilogue (last time chunk only): P(class 1) = sigmoid(l1 - l0),
        # written as a lane-dense (block_b, 128) block.
        @pl.when(tc == n_tc - 1)
        def _():
            score = (jnp.sum(h * wp_ref[...], axis=1, keepdims=True)
                     + bp_ref[...])
            prob_ref[...] = jnp.broadcast_to(jax.nn.sigmoid(score),
                                             prob_ref.shape)

    return kernel


def exercise_lstm_forward(x, params):
    """x: (B, T, 34) float32.  Returns {'has_mistakes': (B,) float32}."""
    B, T, F = x.shape
    assert F == INPUT_SIZE
    H = HIDDEN

    # Batch tiling: pad to sublane granularity, cap block at 128 rows
    # (fits every generation's VMEM budget with f32 state + bf16 gx).
    block_b = min(_round_up(B, 8), 128)
    b_pad = _round_up(B, block_b)

    # Time chunking: fixed chunk with a cdiv grid and a masked ragged tail
    # (never a 1-step-per-grid-iteration cliff for awkward T).
    t_chunk = min(T, 32)
    n_tc = pl.cdiv(T, t_chunk)
    t_pad = n_tc * t_chunk
    rem = T % t_chunk

    xp = x
    if b_pad != B or t_pad != T:
        # Pad the narrow input, NOT the 512-wide gate tensor.
        xp = jnp.pad(x, ((0, b_pad - B), (0, t_pad - T), (0, 0)))

    # Hoisted input projection: transpose the 34-wide input to time-major,
    # one big matmul + bias, then cast to bf16 for streaming into the kernel.
    x_tm = jnp.transpose(xp, (1, 0, 2)).reshape(t_pad * b_pad, F)
    gx = (jnp.dot(x_tm, params['w_ih'], preferred_element_type=jnp.float32)
          + params['b'])
    gx = gx.astype(jnp.bfloat16).reshape(t_pad, b_pad, 4 * H)   # (T, B, 4H) bf16

    n_bb = b_pad // block_b
    kernel = _make_kernel(t_chunk, rem)

    probs = pl.pallas_call(
        kernel,
        out_shape=jax.ShapeDtypeStruct((b_pad, LANE), jnp.float32),
        grid_spec=pltpu.PrefetchScalarGridSpec(
            num_scalar_prefetch=0,
            grid=(n_bb, n_tc),
            in_specs=[
                # Precomputed bf16 gate activations, streamed per (batch, time) chunk.
                pl.BlockSpec((t_chunk, block_b, 4 * H),
                             lambda bb, tc: (tc, bb, 0)),
                pl.BlockSpec((H, 4 * H), lambda bb, tc: (0, 0)),  # W_hh^T (bf16)
                pl.BlockSpec((1, H), lambda bb, tc: (0, 0)),      # w_fc[1]-w_fc[0]
                pl.BlockSpec((1, 1), lambda bb, tc: (0, 0)),      # b_fc[1]-b_fc[0]
            ],
            out_specs=pl.BlockSpec((block_b, LANE), lambda bb, tc: (bb, 0)),
            scratch_shapes=[
                pltpu.VMEM((block_b, H), jnp.float32),   # h state
                pltpu.VMEM((block_b, H), jnp.float32),   # c state
            ],
        ),
        compiler_params=pltpu.CompilerParams(
            dimension_semantics=("parallel", "arbitrary"),
            vmem_limit_bytes=32 * 1024 * 1024),
    )(gx, params['w_hh'], params['w_prob'], params['b_prob'])

    return {'has_mistakes': probs[:B, 0]}


def init_params(key):
    """Deterministic synthetic init matching PyTorch param shapes
    (uniform(-1/sqrt(H), 1/sqrt(H)), as nn.LSTM / nn.Linear do)."""
    ks = jax.random.split(key, 6)
    stdv = 1.0 / jnp.sqrt(jnp.float32(HIDDEN))
    u = lambda k, shp: jax.random.uniform(k, shp, jnp.float32, -stdv, stdv)
    w_ih = u(ks[0], (4 * HIDDEN, INPUT_SIZE))   # weight_ih_l0
    w_hh = u(ks[1], (4 * HIDDEN, HIDDEN))       # weight_hh_l0
    b_ih = u(ks[2], (4 * HIDDEN,))              # bias_ih_l0
    b_hh = u(ks[3], (4 * HIDDEN,))              # bias_hh_l0
    w_fc = u(ks[4], (NUM_CLASSES, HIDDEN))      # fc.weight
    b_fc = u(ks[5], (NUM_CLASSES,))             # fc.bias
    return w_ih, w_hh, b_ih, b_hh, w_fc, b_fc


if __name__ == "__main__":
    key = jax.random.PRNGKey(0)
    kx, kp = jax.random.split(key)

    B, T = 2, 8
    x = jax.random.normal(kx, (B, T, INPUT_SIZE), dtype=jnp.float32)
    params = prepare_params(*init_params(kp))

    fwd = jax.jit(exercise_lstm_forward)
    out = fwd(x, params)
    jax.block_until_ready(out['has_mistakes'])
    assert out['has_mistakes'].shape == (B,)
    assert bool(jnp.all(jnp.isfinite(out['has_mistakes'])))
    print("KERNEL_OK")
</pallas_src>

<mosaic_0001>
module attributes {stable_mosaic.version = 11 : i64} {
  func.func @kernel(%arg0: i32, %arg1: i32, %arg2: memref<8x8x512xbf16, #tpu.memory_space<vmem>>, %arg3: memref<128x512xbf16, #tpu.memory_space<vmem>>, %arg4: memref<1x128xf32, #tpu.memory_space<vmem>>, %arg5: memref<1x1xf32, #tpu.memory_space<vmem>>, %arg6: memref<8x128xf32, #tpu.memory_space<vmem>>, %arg7: memref<8x128xf32, #tpu.memory_space<vmem>>, %arg8: memref<8x128xf32, #tpu.memory_space<vmem>>) attributes {dimension_semantics = [#tpu.dimension_semantics<parallel>, #tpu.dimension_semantics<arbitrary>], iteration_bounds = array<i64: 1, 1>, scalar_prefetch = 0 : i64, scratch_operands = 2 : i64, tpu.core_type = #tpu.core_type<tc>, window_params = [{transform_indices = @transform_0, window_bounds = array<i64: 8, 8, 512>}, {pipeline_mode = #tpu.pipeline_mode<synchronous>, transform_indices = @transform_1, window_bounds = array<i64: 128, 512>}, {pipeline_mode = #tpu.pipeline_mode<synchronous>, transform_indices = @transform_2, window_bounds = array<i64: 1, 128>}, {pipeline_mode = #tpu.pipeline_mode<synchronous>, transform_indices = @transform_3, window_bounds = array<i64: 1, 1>}, {transform_indices = @transform_4, window_bounds = array<i64: 8, 128>}]} {
    %c0_i32 = arith.constant 0 : i32
    %0 = arith.cmpi eq, %arg1, %c0_i32 : i32
    %1 = arith.extui %0 : i1 to i32
    %c0_i32_0 = arith.constant 0 : i32
    %2 = arith.cmpi ne, %1, %c0_i32_0 : i32
    scf.if %2 {
      %cst_58 = arith.constant 0.000000e+00 : f32
      %202 = vector.broadcast %cst_58 : f32 to vector<8x128xf32>
      %c0_59 = arith.constant 0 : index
      %c0_60 = arith.constant 0 : index
      %203 = vector.load %arg7[%c0_59, %c0_60] : memref<8x128xf32, #tpu.memory_space<vmem>>, vector<8x128xf32>
      tpu.vector_store %arg7[%c0_59, %c0_60], %202 {strides = array<i32>} : memref<8x128xf32, #tpu.memory_space<vmem>>, vector<8x128xf32>,
      %cst_61 = arith.constant 0.000000e+00 : f32
      %204 = vector.broadcast %cst_61 : f32 to vector<8x128xf32>
      %c0_62 = arith.constant 0 : index
      %c0_63 = arith.constant 0 : index
      %205 = vector.load %arg8[%c0_62, %c0_63] : memref<8x128xf32, #tpu.memory_space<vmem>>, vector<8x128xf32>
      tpu.vector_store %arg8[%c0_62, %c0_63], %204 {strides = array<i32>} : memref<8x128xf32, #tpu.memory_space<vmem>>, vector<8x128xf32>,
    } else {
    }
    %c0 = arith.constant 0 : index
    %c0_1 = arith.constant 0 : index
    %3 = vector.load %arg7[%c0, %c0_1] : memref<8x128xf32, #tpu.memory_space<vmem>>, vector<8x128xf32>
    %c0_2 = arith.constant 0 : index
    %c0_3 = arith.constant 0 : index
    %4 = vector.load %arg8[%c0_2, %c0_3] : memref<8x128xf32, #tpu.memory_space<vmem>>, vector<8x128xf32>
    %c0_i32_4 = arith.constant 0 : i32
    %5 = arith.index_cast %c0_i32_4 : i32 to index
    %c0_5 = arith.constant 0 : index
    %c0_6 = arith.constant 0 : index
    %6 = vector.load %arg2[%5, %c0_5, %c0_6] : memref<8x8x512xbf16, #tpu.memory_space<vmem>>, vector<1x8x512xbf16>
    %7 = vector.shape_cast %6 : vector<1x8x512xbf16> to vector<8x512xbf16>
    %8 = arith.extf %7 : vector<8x512xbf16> to vector<8x512xf32>
    %9 = arith.truncf %3 : vector<8x128xf32> to vector<8x128xbf16>
    %c0_7 = arith.constant 0 : index
    %c0_8 = arith.constant 0 : index
    %10 = vector.load %arg3[%c0_7, %c0_8] : memref<128x512xbf16, #tpu.memory_space<vmem>>, vector<128x512xbf16>
    %cst = arith.constant dense<0.000000e+00> : vector<8x512xf32>
    %11 = tpu.matmul %9, %10, %cst {dimension_numbers = #tpu.dot_dimension_numbers<[1], [0], [0], [1], [0, 0, 1, 1], [], []>} : vector<8x128xbf16>, vector<128x512xbf16>, vector<8x512xf32> -> vector<8x512xf32>
    %12 = arith.addf %8, %11 : vector<8x512xf32>
    %13 = vector.extract_strided_slice %12 {offsets = [0, 0], sizes = [8, 384], strides = [1, 1]} : vector<8x512xf32> to vector<8x384xf32>
    %14 = arith.negf %13 : vector<8x384xf32>
    %15 = math.exp %14 : vector<8x384xf32>
    %cst_9 = arith.constant 1.000000e+00 : f32
    %16 = vector.broadcast %cst_9 : f32 to vector<8x384xf32>
    %17 = arith.addf %16, %15 : vector<8x384xf32>
    %18 = arith.divf %16, %17 : vector<8x384xf32>
    %19 = vector.extract_strided_slice %18 {offsets = [0, 0], sizes = [8, 128], strides = [1, 1]} : vector<8x384xf32> to vector<8x128xf32>
    %20 = vector.extract_strided_slice %18 {offsets = [0, 128], sizes = [8, 128], strides = [1, 1]} : vector<8x384xf32> to vector<8x128xf32>
    %21 = vector.extract_strided_slice %18 {offsets = [0, 256], sizes = [8, 128], strides = [1, 1]} : vector<8x384xf32> to vector<8x128xf32>
    %22 = vector.extract_strided_slice %12 {offsets = [0, 384], sizes = [8, 128], strides = [1, 1]} : vector<8x512xf32> to vector<8x128xf32>
    %23 = math.tanh %22 : vector<8x128xf32>
    %24 = arith.mulf %20, %4 : vector<8x128xf32>
    %25 = arith.mulf %19, %23 : vector<8x128xf32>
    %26 = arith.addf %24, %25 : vector<8x128xf32>
    %27 = math.tanh %26 : vector<8x128xf32>
    %28 = arith.mulf %21, %27 : vector<8x128xf32>
    %c1_i32 = arith.constant 1 : i32
    %29 = arith.index_cast %c1_i32 : i32 to index
    %c0_10 = arith.constant 0 : index
    %c0_11 = arith.constant 0 : index
    %30 = vector.load %arg2[%29, %c0_10, %c0_11] : memref<8x8x512xbf16, #tpu.memory_space<vmem>>, vector<1x8x512xbf16>
    %31 = vector.shape_cast %30 : vector<1x8x512xbf16> to vector<8x512xbf16>
    %32 = arith.extf %31 : vector<8x512xbf16> to vector<8x512xf32>
    %33 = arith.truncf %28 : vector<8x128xf32> to vector<8x128xbf16>
    %c0_12 = arith.constant 0 : index
    %c0_13 = arith.constant 0 : index
    %34 = vector.load %arg3[%c0_12, %c0_13] : memref<128x512xbf16, #tpu.memory_space<vmem>>, vector<128x512xbf16>
    %cst_14 = arith.constant dense<0.000000e+00> : vector<8x512xf32>
    %35 = tpu.matmul %33, %34, %cst_14 {dimension_numbers = #tpu.dot_dimension_numbers<[1], [0], [0], [1], [0, 0, 1, 1], [], []>} : vector<8x128xbf16>, vector<128x512xbf16>, vector<8x512xf32> -> vector<8x512xf32>
    %36 = arith.addf %32, %35 : vector<8x512xf32>
    %37 = vector.extract_strided_slice %36 {offsets = [0, 0], sizes = [8, 384], strides = [1, 1]} : vector<8x512xf32> to vector<8x384xf32>
    %38 = arith.negf %37 : vector<8x384xf32>
    %39 = math.exp %38 : vector<8x384xf32>
    %cst_15 = arith.constant 1.000000e+00 : f32
    %40 = vector.broadcast %cst_15 : f32 to vector<8x384xf32>
    %41 = arith.addf %40, %39 : vector<8x384xf32>
    %42 = arith.divf %40, %41 : vector<8x384xf32>
    %43 = vector.extract_strided_slice %42 {offsets = [0, 0], sizes = [8, 128], strides = [1, 1]} : vector<8x384xf32> to vector<8x128xf32>
    %44 = vector.extract_strided_slice %42 {offsets = [0, 128], sizes = [8, 128], strides = [1, 1]} : vector<8x384xf32> to vector<8x128xf32>
    %45 = vector.extract_strided_slice %42 {offsets = [0, 256], sizes = [8, 128], strides = [1, 1]} : vector<8x384xf32> to vector<8x128xf32>
    %46 = vector.extract_strided_slice %36 {offsets = [0, 384], sizes = [8, 128], strides = [1, 1]} : vector<8x512xf32> to vector<8x128xf32>
    %47 = math.tanh %46 : vector<8x128xf32>
    %48 = arith.mulf %44, %26 : vector<8x128xf32>
    %49 = arith.mulf %43, %47 : vector<8x128xf32>
    %50 = arith.addf %48, %49 : vector<8x128xf32>
    %51 = math.tanh %50 : vector<8x128xf32>
    %52 = arith.mulf %45, %51 : vector<8x128xf32>
    %c2_i32 = arith.constant 2 : i32
    %53 = arith.index_cast %c2_i32 : i32 to index
    %c0_16 = arith.constant 0 : index
    %c0_17 = arith.constant 0 : index
    %54 = vector.load %arg2[%53, %c0_16, %c0_17] : memref<8x8x512xbf16, #tpu.memory_space<vmem>>, vector<1x8x512xbf16>
    %55 = vector.shape_cast %54 : vector<1x8x512xbf16> to vector<8x512xbf16>
    %56 = arith.extf %55 : vector<8x512xbf16> to vector<8x512xf32>
    %57 = arith.truncf %52 : vector<8x128xf32> to vector<8x128xbf16>
    %c0_18 = arith.constant 0 : index
    %c0_19 = arith.constant 0 : index
    %58 = vector.load %arg3[%c0_18, %c0_19] : memref<128x512xbf16, #tpu.memory_space<vmem>>, vector<128x512xbf16>
    %cst_20 = arith.constant dense<0.000000e+00> : vector<8x512xf32>
    %59 = tpu.matmul %57, %58, %cst_20 {dimension_numbers = #tpu.dot_dimension_numbers<[1], [0], [0], [1], [0, 0, 1, 1], [], []>} : vector<8x128xbf16>, vector<128x512xbf16>, vector<8x512xf32> -> vector<8x512xf32>
    %60 = arith.addf %56, %59 : vector<8x512xf32>
    %61 = vector.extract_strided_slice %60 {offsets = [0, 0], sizes = [8, 384], strides = [1, 1]} : vector<8x512xf32> to vector<8x384xf32>
    %62 = arith.negf %61 : vector<8x384xf32>
    %63 = math.exp %62 : vector<8x384xf32>
    %cst_21 = arith.constant 1.000000e+00 : f32
    %64 = vector.broadcast %cst_21 : f32 to vector<8x384xf32>
    %65 = arith.addf %64, %63 : vector<8x384xf32>
    %66 = arith.divf %64, %65 : vector<8x384xf32>
    %67 = vector.extract_strided_slice %66 {offsets = [0, 0], sizes = [8, 128], strides = [1, 1]} : vector<8x384xf32> to vector<8x128xf32>
    %68 = vector.extract_strided_slice %66 {offsets = [0, 128], sizes = [8, 128], strides = [1, 1]} : vector<8x384xf32> to vector<8x128xf32>
    %69 = vector.extract_strided_slice %66 {offsets = [0, 256], sizes = [8, 128], strides = [1, 1]} : vector<8x384xf32> to vector<8x128xf32>
    %70 = vector.extract_strided_slice %60 {offsets = [0, 384], sizes = [8, 128], strides = [1, 1]} : vector<8x512xf32> to vector<8x128xf32>
    %71 = math.tanh %70 : vector<8x128xf32>
    %72 = arith.mulf %68, %50 : vector<8x128xf32>
    %73 = arith.mulf %67, %71 : vector<8x128xf32>
    %74 = arith.addf %72, %73 : vector<8x128xf32>
    %75 = math.tanh %74 : vector<8x128xf32>
    %76 = arith.mulf %69, %75 : vector<8x128xf32>
    %c3_i32 = arith.constant 3 : i32
    %77 = arith.index_cast %c3_i32 : i32 to index
    %c0_22 = arith.constant 0 : index
    %c0_23 = arith.constant 0 : index
    %78 = vector.load %arg2[%77, %c0_22, %c0_23] : memref<8x8x512xbf16, #tpu.memory_space<vmem>>, vector<1x8x512xbf16>
    %79 = vector.shape_cast %78 : vector<1x8x512xbf16> to vector<8x512xbf16>
    %80 = arith.extf %79 : vector<8x512xbf16> to vector<8x512xf32>
    %81 = arith.truncf %76 : vector<8x128xf32> to vector<8x128xbf16>
    %c0_24 = arith.constant 0 : index
    %c0_25 = arith.constant 0 : index
    %82 = vector.load %arg3[%c0_24, %c0_25] : memref<128x512xbf16, #tpu.memory_space<vmem>>, vector<128x512xbf16>
    %cst_26 = arith.constant dense<0.000000e+00> : vector<8x512xf32>
    %83 = tpu.matmul %81, %82, %cst_26 {dimension_numbers = #tpu.dot_dimension_numbers<[1], [0], [0], [1], [0, 0, 1, 1], [], []>} : vector<8x128xbf16>, vector<128x512xbf16>, vector<8x512xf32> -> vector<8x512xf32>
    %84 = arith.addf %80, %83 : vector<8x512xf32>
    %85 = vector.extract_strided_slice %84 {offsets = [0, 0], sizes = [8, 384], strides = [1, 1]} : vector<8x512xf32> to vector<8x384xf32>
    %86 = arith.negf %85 : vector<8x384xf32>
    %87 = math.exp %86 : vector<8x384xf32>
    %cst_27 = arith.constant 1.000000e+00 : f32
    %88 = vector.broadcast %cst_27 : f32 to vector<8x384xf32>
    %89 = arith.addf %88, %87 : vector<8x384xf32>
    %90 = arith.divf %88, %89 : vector<8x384xf32>
    %91 = vector.extract_strided_slice %90 {offsets = [0, 0], sizes = [8, 128], strides = [1, 1]} : vector<8x384xf32> to vector<8x128xf32>
    %92 = vector.extract_strided_slice %90 {offsets = [0, 128], sizes = [8, 128], strides = [1, 1]} : vector<8x384xf32> to vector<8x128xf32>
    %93 = vector.extract_strided_slice %90 {offsets = [0, 256], sizes = [8, 128], strides = [1, 1]} : vector<8x384xf32> to vector<8x128xf32>
    %94 = vector.extract_strided_slice %84 {offsets = [0, 384], sizes = [8, 128], strides = [1, 1]} : vector<8x512xf32> to vector<8x128xf32>
    %95 = math.tanh %94 : vector<8x128xf32>
    %96 = arith.mulf %92, %74 : vector<8x128xf32>
    %97 = arith.mulf %91, %95 : vector<8x128xf32>
    %98 = arith.addf %96, %97 : vector<8x128xf32>
    %99 = math.tanh %98 : vector<8x128xf32>
    %100 = arith.mulf %93, %99 : vector<8x128xf32>
    %c4_i32 = arith.constant 4 : i32
    %101 = arith.index_cast %c4_i32 : i32 to index
    %c0_28 = arith.constant 0 : index
    %c0_29 = arith.constant 0 : index
    %102 = vector.load %arg2[%101, %c0_28, %c0_29] : memref<8x8x512xbf16, #tpu.memory_space<vmem>>, vector<1x8x512xbf16>
    %103 = vector.shape_cast %102 : vector<1x8x512xbf16> to vector<8x512xbf16>
    %104 = arith.extf %103 : vector<8x512xbf16> to vector<8x512xf32>
    %105 = arith.truncf %100 : vector<8x128xf32> to vector<8x128xbf16>
    %c0_30 = arith.constant 0 : index
    %c0_31 = arith.constant 0 : index
    %106 = vector.load %arg3[%c0_30, %c0_31] : memref<128x512xbf16, #tpu.memory_space<vmem>>, vector<128x512xbf16>
    %cst_32 = arith.constant dense<0.000000e+00> : vector<8x512xf32>
    %107 = tpu.matmul %105, %106, %cst_32 {dimension_numbers = #tpu.dot_dimension_numbers<[1], [0], [0], [1], [0, 0, 1, 1], [], []>} : vector<8x128xbf16>, vector<128x512xbf16>, vector<8x512xf32> -> vector<8x512xf32>
    %108 = arith.addf %104, %107 : vector<8x512xf32>
    %109 = vector.extract_strided_slice %108 {offsets = [0, 0], sizes = [8, 384], strides = [1, 1]} : vector<8x512xf32> to vector<8x384xf32>
    %110 = arith.negf %109 : vector<8x384xf32>
    %111 = math.exp %110 : vector<8x384xf32>
    %cst_33 = arith.constant 1.000000e+00 : f32
    %112 = vector.broadcast %cst_33 : f32 to vector<8x384xf32>
    %113 = arith.addf %112, %111 : vector<8x384xf32>
    %114 = arith.divf %112, %113 : vector<8x384xf32>
    %115 = vector.extract_strided_slice %114 {offsets = [0, 0], sizes = [8, 128], strides = [1, 1]} : vector<8x384xf32> to vector<8x128xf32>
    %116 = vector.extract_strided_slice %114 {offsets = [0, 128], sizes = [8, 128], strides = [1, 1]} : vector<8x384xf32> to vector<8x128xf32>
    %117 = vector.extract_strided_slice %114 {offsets = [0, 256], sizes = [8, 128], strides = [1, 1]} : vector<8x384xf32> to vector<8x128xf32>
    %118 = vector.extract_strided_slice %108 {offsets = [0, 384], sizes = [8, 128], strides = [1, 1]} : vector<8x512xf32> to vector<8x128xf32>
    %119 = math.tanh %118 : vector<8x128xf32>
    %120 = arith.mulf %116, %98 : vector<8x128xf32>
    %121 = arith.mulf %115, %119 : vector<8x128xf32>
    %122 = arith.addf %120, %121 : vector<8x128xf32>
    %123 = math.tanh %122 : vector<8x128xf32>
    %124 = arith.mulf %117, %123 : vector<8x128xf32>
    %c5_i32 = arith.constant 5 : i32
    %125 = arith.index_cast %c5_i32 : i32 to index
    %c0_34 = arith.constant 0 : index
    %c0_35 = arith.constant 0 : index
    %126 = vector.load %arg2[%125, %c0_34, %c0_35] : memref<8x8x512xbf16, #tpu.memory_space<vmem>>, vector<1x8x512xbf16>
    %127 = vector.shape_cast %126 : vector<1x8x512xbf16> to vector<8x512xbf16>
    %128 = arith.extf %127 : vector<8x512xbf16> to vector<8x512xf32>
    %129 = arith.truncf %124 : vector<8x128xf32> to vector<8x128xbf16>
    %c0_36 = arith.constant 0 : index
    %c0_37 = arith.constant 0 : index
    %130 = vector.load %arg3[%c0_36, %c0_37] : memref<128x512xbf16, #tpu.memory_space<vmem>>, vector<128x512xbf16>
    %cst_38 = arith.constant dense<0.000000e+00> : vector<8x512xf32>
    %131 = tpu.matmul %129, %130, %cst_38 {dimension_numbers = #tpu.dot_dimension_numbers<[1], [0], [0], [1], [0, 0, 1, 1], [], []>} : vector<8x128xbf16>, vector<128x512xbf16>, vector<8x512xf32> -> vector<8x512xf32>
    %132 = arith.addf %128, %131 : vector<8x512xf32>
    %133 = vector.extract_strided_slice %132 {offsets = [0, 0], sizes = [8, 384], strides = [1, 1]} : vector<8x512xf32> to vector<8x384xf32>
    %134 = arith.negf %133 : vector<8x384xf32>
    %135 = math.exp %134 : vector<8x384xf32>
    %cst_39 = arith.constant 1.000000e+00 : f32
    %136 = vector.broadcast %cst_39 : f32 to vector<8x384xf32>
    %137 = arith.addf %136, %135 : vector<8x384xf32>
    %138 = arith.divf %136, %137 : vector<8x384xf32>
    %139 = vector.extract_strided_slice %138 {offsets = [0, 0], sizes = [8, 128], strides = [1, 1]} : vector<8x384xf32> to vector<8x128xf32>
    %140 = vector.extract_strided_slice %138 {offsets = [0, 128], sizes = [8, 128], strides = [1, 1]} : vector<8x384xf32> to vector<8x128xf32>
    %141 = vector.extract_strided_slice %138 {offsets = [0, 256], sizes = [8, 128], strides = [1, 1]} : vector<8x384xf32> to vector<8x128xf32>
    %142 = vector.extract_strided_slice %132 {offsets = [0, 384], sizes = [8, 128], strides = [1, 1]} : vector<8x512xf32> to vector<8x128xf32>
    %143 = math.tanh %142 : vector<8x128xf32>
    %144 = arith.mulf %140, %122 : vector<8x128xf32>
    %145 = arith.mulf %139, %143 : vector<8x128xf32>
    %146 = arith.addf %144, %145 : vector<8x128xf32>
    %147 = math.tanh %146 : vector<8x128xf32>
    %148 = arith.mulf %141, %147 : vector<8x128xf32>
    %c6_i32 = arith.constant 6 : i32
    %149 = arith.index_cast %c6_i32 : i32 to index
    %c0_40 = arith.constant 0 : index
    %c0_41 = arith.constant 0 : index
    %150 = vector.load %arg2[%149, %c0_40, %c0_41] : memref<8x8x512xbf16, #tpu.memory_space<vmem>>, vector<1x8x512xbf16>
    %151 = vector.shape_cast %150 : vector<1x8x512xbf16> to vector<8x512xbf16>
    %152 = arith.extf %151 : vector<8x512xbf16> to vector<8x512xf32>
    %153 = arith.truncf %148 : vector<8x128xf32> to vector<8x128xbf16>
    %c0_42 = arith.constant 0 : index
    %c0_43 = arith.constant 0 : index
    %154 = vector.load %arg3[%c0_42, %c0_43] : memref<128x512xbf16, #tpu.memory_space<vmem>>, vector<128x512xbf16>
    %cst_44 = arith.constant dense<0.000000e+00> : vector<8x512xf32>
    %155 = tpu.matmul %153, %154, %cst_44 {dimension_numbers = #tpu.dot_dimension_numbers<[1], [0], [0], [1], [0, 0, 1, 1], [], []>} : vector<8x128xbf16>, vector<128x512xbf16>, vector<8x512xf32> -> vector<8x512xf32>
    %156 = arith.addf %152, %155 : vector<8x512xf32>
    %157 = vector.extract_strided_slice %156 {offsets = [0, 0], sizes = [8, 384], strides = [1, 1]} : vector<8x512xf32> to vector<8x384xf32>
    %158 = arith.negf %157 : vector<8x384xf32>
    %159 = math.exp %158 : vector<8x384xf32>
    %cst_45 = arith.constant 1.000000e+00 : f32
    %160 = vector.broadcast %cst_45 : f32 to vector<8x384xf32>
    %161 = arith.addf %160, %159 : vector<8x384xf32>
    %162 = arith.divf %160, %161 : vector<8x384xf32>
    %163 = vector.extract_strided_slice %162 {offsets = [0, 0], sizes = [8, 128], strides = [1, 1]} : vector<8x384xf32> to vector<8x128xf32>
    %164 = vector.extract_strided_slice %162 {offsets = [0, 128], sizes = [8, 128], strides = [1, 1]} : vector<8x384xf32> to vector<8x128xf32>
    %165 = vector.extract_strided_slice %162 {offsets = [0, 256], sizes = [8, 128], strides = [1, 1]} : vector<8x384xf32> to vector<8x128xf32>
    %166 = vector.extract_strided_slice %156 {offsets = [0, 384], sizes = [8, 128], strides = [1, 1]} : vector<8x512xf32> to vector<8x128xf32>
    %167 = math.tanh %166 : vector<8x128xf32>
    %168 = arith.mulf %164, %146 : vector<8x128xf32>
    %169 = arith.mulf %163, %167 : vector<8x128xf32>
    %170 = arith.addf %168, %169 : vector<8x128xf32>
    %171 = math.tanh %170 : vector<8x128xf32>
    %172 = arith.mulf %165, %171 : vector<8x128xf32>
    %c7_i32 = arith.constant 7 : i32
    %173 = arith.index_cast %c7_i32 : i32 to index
    %c0_46 = arith.constant 0 : index
    %c0_47 = arith.constant 0 : index
    %174 = vector.load %arg2[%173, %c0_46, %c0_47] : memref<8x8x512xbf16, #tpu.memory_space<vmem>>, vector<1x8x512xbf16>
    %175 = vector.shape_cast %174 : vector<1x8x512xbf16> to vector<8x512xbf16>
    %176 = arith.extf %175 : vector<8x512xbf16> to vector<8x512xf32>
    %177 = arith.truncf %172 : vector<8x128xf32> to vector<8x128xbf16>
    %c0_48 = arith.constant 0 : index
    %c0_49 = arith.constant 0 : index
    %178 = vector.load %arg3[%c0_48, %c0_49] : memref<128x512xbf16, #tpu.memory_space<vmem>>, vector<128x512xbf16>
    %cst_50 = arith.constant dense<0.000000e+00> : vector<8x512xf32>
    %179 = tpu.matmul %177, %178, %cst_50 {dimension_numbers = #tpu.dot_dimension_numbers<[1], [0], [0], [1], [0, 0, 1, 1], [], []>} : vector<8x128xbf16>, vector<128x512xbf16>, vector<8x512xf32> -> vector<8x512xf32>
    %180 = arith.addf %176, %179 : vector<8x512xf32>
    %181 = vector.extract_strided_slice %180 {offsets = [0, 0], sizes = [8, 384], strides = [1, 1]} : vector<8x512xf32> to vector<8x384xf32>
    %182 = arith.negf %181 : vector<8x384xf32>
    %183 = math.exp %182 : vector<8x384xf32>
    %cst_51 = arith.constant 1.000000e+00 : f32
    %184 = vector.broadcast %cst_51 : f32 to vector<8x384xf32>
    %185 = arith.addf %184, %183 : vector<8x384xf32>
    %186 = arith.divf %184, %185 : vector<8x384xf32>
    %187 = vector.extract_strided_slice %186 {offsets = [0, 0], sizes = [8, 128], strides = [1, 1]} : vector<8x384xf32> to vector<8x128xf32>
    %188 = vector.extract_strided_slice %186 {offsets = [0, 128], sizes = [8, 128], strides = [1, 1]} : vector<8x384xf32> to vector<8x128xf32>
    %189 = vector.extract_strided_slice %186 {offsets = [0, 256], sizes = [8, 128], strides = [1, 1]} : vector<8x384xf32> to vector<8x128xf32>
    %190 = vector.extract_strided_slice %180 {offsets = [0, 384], sizes = [8, 128], strides = [1, 1]} : vector<8x512xf32> to vector<8x128xf32>
    %191 = math.tanh %190 : vector<8x128xf32>
    %192 = arith.mulf %188, %170 : vector<8x128xf32>
    %193 = arith.mulf %187, %191 : vector<8x128xf32>
    %194 = arith.addf %192, %193 : vector<8x128xf32>
    %195 = math.tanh %194 : vector<8x128xf32>
    %196 = arith.mulf %189, %195 : vector<8x128xf32>
    %c8_i32 = arith.constant 8 : i32
    %c0_52 = arith.constant 0 : index
    %c0_53 = arith.constant 0 : index
    %197 = vector.load %arg7[%c0_52, %c0_53] : memref<8x128xf32, #tpu.memory_space<vmem>>, vector<8x128xf32>
    tpu.vector_store %arg7[%c0_52, %c0_53], %196 {strides = array<i32>} : memref<8x128xf32, #tpu.memory_space<vmem>>, vector<8x128xf32>,
    %c0_54 = arith.constant 0 : index
    %c0_55 = arith.constant 0 : index
    %198 = vector.load %arg8[%c0_54, %c0_55] : memref<8x128xf32, #tpu.memory_space<vmem>>, vector<8x128xf32>
    tpu.vector_store %arg8[%c0_54, %c0_55], %194 {strides = array<i32>} : memref<8x128xf32, #tpu.memory_space<vmem>>, vector<8x128xf32>,
    %c0_i32_56 = arith.constant 0 : i32
    %199 = arith.cmpi eq, %arg1, %c0_i32_56 : i32
    %200 = arith.extui %199 : i1 to i32
    %c0_i32_57 = arith.constant 0 : i32
    %201 = arith.cmpi ne, %200, %c0_i32_57 : i32
    scf.if %201 {
      %c0_58 = arith.constant 0 : index
      %c0_59 = arith.constant 0 : index
      %202 = vector.load %arg4[%c0_58, %c0_59] : memref<1x128xf32, #tpu.memory_space<vmem>>, vector<1x128xf32>
      %203 = vector.broadcast %202 : vector<1x128xf32> to vector<8x128xf32>
      %204 = arith.mulf %196, %203 : vector<8x128xf32>
      %cst_60 = arith.constant dense<0.000000e+00> : vector<8xf32>
      %205 = vector.multi_reduction <add>, %204, %cst_60 [1] : vector<8x128xf32> to vector<8xf32>
      %206 = vector.shape_cast %205 : vector<8xf32> to vector<8x1xf32>
      %c0_61 = arith.constant 0 : index
      %c0_62 = arith.constant 0 : index
      %207 = vector.load %arg5[%c0_61, %c0_62] : memref<1x1xf32, #tpu.memory_space<vmem>>, vector<1x1xf32>
      %208 = vector.broadcast %207 : vector<1x1xf32> to vector<8x1xf32>
      %209 = arith.addf %206, %208 : vector<8x1xf32>
      %210 = arith.negf %209 : vector<8x1xf32>
      %211 = math.exp %210 : vector<8x1xf32>
      %cst_63 = arith.constant 1.000000e+00 : f32
      %212 = vector.broadcast %cst_63 : f32 to vector<8x1xf32>
      %213 = arith.addf %212, %211 : vector<8x1xf32>
      %214 = arith.divf %212, %213 : vector<8x1xf32>
      %215 = vector.shape_cast %214 : vector<8x1xf32> to vector<8x1xf32>
      %216 = vector.broadcast %215 : vector<8x1xf32> to vector<8x128xf32>
      %c0_64 = arith.constant 0 : index
      %c0_65 = arith.constant 0 : index
      %217 = vector.load %arg6[%c0_64, %c0_65] : memref<8x128xf32, #tpu.memory_space<vmem>>, vector<8x128xf32>
      tpu.vector_store %arg6[%c0_64, %c0_65], %216 {strides = array<i32>} : memref<8x128xf32, #tpu.memory_space<vmem>>, vector<8x128xf32>,
    } else {
    }
    return
  }
  func.func @transform_0(%arg0: i32, %arg1: i32) -> (i32, i32, i32) {
    %c0_i32 = arith.constant 0 : i32
    %c0_i32_0 = arith.constant 0 : i32
    return %arg1, %arg0, %c0_i32 : i32, i32, i32
  }
  func.func @transform_1(%arg0: i32, %arg1: i32) -> (i32, i32) {
    %c0_i32 = arith.constant 0 : i32
    %c0_i32_0 = arith.constant 0 : i32
    %c0_i32_1 = arith.constant 0 : i32
    return %c0_i32, %c0_i32_0 : i32, i32
  }
  func.func @transform_2(%arg0: i32, %arg1: i32) -> (i32, i32) {
    %c0_i32 = arith.constant 0 : i32
    %c0_i32_0 = arith.constant 0 : i32
    %c0_i32_1 = arith.constant 0 : i32
    return %c0_i32, %c0_i32_0 : i32, i32
  }
  func.func @transform_3(%arg0: i32, %arg1: i32) -> (i32, i32) {
    %c0_i32 = arith.constant 0 : i32
    %c0_i32_0 = arith.constant 0 : i32
    %c0_i32_1 = arith.constant 0 : i32
    return %c0_i32, %c0_i32_0 : i32, i32
  }
  func.func @transform_4(%arg0: i32, %arg1: i32) -> (i32, i32) {
    %c0_i32 = arith.constant 0 : i32
    %c0_i32_0 = arith.constant 0 : i32
    return %arg0, %c0_i32 : i32, i32
  }
}

</mosaic_0001>

<bundles_post_ra>
// kernel: exercise_lstm_forward.1
= control target key start
LH: loop header
LB: loop body
LE: loop exit
PB: predicated region body
PF: predicated region fallthrough
CT: control target
= control target key end

     0   :  { %v1490_v1 = vmov 0   ;;  %v1491_v33 = vmov 0.0|0.0   ;;  %s2095_s1 = inlined_call_operand.vmem [shape: bf16[128,512], index: 1, kind: input, shape index: {}]   ;;  %s2096_s0 = inlined_call_operand.vmem [shape: bf16[8,8,512], index: 0, kind: input, shape index: {}]   ;;  %s2097_s3 = inlined_call_operand.<no memory space> [shape: f32[1,1], index: 3, kind: input, shape index: {}]   ;;  %s2098_s2 = inlined_call_operand.vmem [shape: f32[1,128], index: 2, kind: input, shape index: {}]   ;;  %s2099_s4 = inlined_call_operand.vmem [shape: f32[8,128], index: 4, kind: output, shape index: {}]  }
   0x1   :  { %v1520_v0 = vld [vmem:[%s2095_s1 + $0x4] ss:$16 sps:$4 sm:$0xff]   ;;  %259 = vmatprep.mubr.bf16.mxu0 %v1490_v1  ;;  %300 = vmatprep.mubr.bf16.mxu1 %v1490_v1  ;;  %v1527_v2 = vld [vmem:[%s2095_s1] ss:$16 sps:$4 sm:$0xff]   ;;  %v1551_v6 = vld [vmem:[%s2095_s1 + $0xc] ss:$16 sps:$4 sm:$0xff]  }
   0x2   :  { %1277 = vset.pattern.permute.xlu0 %v1490_v1  ;;  %227 = vmatprep.subr.bf16.mxu0 %v1520_v0  ;;  %v1534_v3 = vld [vmem:[%s2095_s1 + $0x24] ss:$16 sps:$4 sm:$0xff]   ;;  %v1540_v4 = vld [vmem:[%s2095_s1 + $0x20] ss:$16 sps:$4 sm:$0xff]   ;;  %v1556_v7 = vld [vmem:[%s2095_s1 + $0x8] ss:$16 sps:$4 sm:$0xff]  }
   0x3   :  { %228 = vmatpush1.bf16.msra.mxu0 %v1527_v2  ;;  %v1546_v5 = vld [vmem:[%s2095_s1 + $0x44] ss:$16 sps:$4 sm:$0xff]   ;;  %v1562_v8 = vld [vmem:[%s2095_s1 + $0x40] ss:$16 sps:$4 sm:$0xff]   ;;  %268 = vmatprep.subr.bf16.mxu1 %v1551_v6  ;;  %v1575_v10 = vld [vmem:[%s2095_s1 + $0x2c] ss:$16 sps:$4 sm:$0xff]  }
   0x4   :  { %229 = vmatprep.subr.bf16.mxu0 %v1534_v3  ;;  %v1569_v9 = vld [vmem:[%s2095_s1 + $0x64] ss:$16 sps:$4 sm:$0xff]   ;;  %269 = vmatpush1.bf16.msra.mxu1 %v1556_v7  ;;  %v1580_v11 = vld [vmem:[%s2095_s1 + $0x28] ss:$16 sps:$4 sm:$0xff]   ;;  %v1587_v12 = vld [vmem:[%s2095_s1 + $0x60] ss:$16 sps:$4 sm:$0xff]  }
   0x5   :  { %270 = vmatprep.subr.bf16.mxu1 %v1575_v10  ;;  %v1592_v13 = vld [vmem:[%s2095_s1 + $0x84] ss:$16 sps:$4 sm:$0xff]   ;;  %v1597_v14 = vld [vmem:[%s2095_s1 + $0x4c] ss:$16 sps:$4 sm:$0xff]   ;;  %v1604_v15 = vld [vmem:[%s2095_s1 + $0x48] ss:$16 sps:$4 sm:$0xff]  }
   0x6   :  { %v1610_v16 = vld [vmem:[%s2095_s1 + $0x6c] ss:$16 sps:$4 sm:$0xff]   ;;  %v1616_v17 = vld [vmem:[%s2095_s1 + $0x80] ss:$16 sps:$4 sm:$0xff]   ;;  %v1622_v18 = vld [vmem:[%s2095_s1 + $0xa4] ss:$16 sps:$4 sm:$0xff]  }
   0x7   :  { %230 = vmatpush1.bf16.msra.mxu0 %v1540_v4  ;;  %v1628_v19 = vld [vmem:[%s2095_s1 + $0x68] ss:$16 sps:$4 sm:$0xff]   ;;  %v1634_v20 = vld [vmem:[%s2095_s1 + $0x8c] ss:$16 sps:$4 sm:$0xff]   ;;  %v1640_v21 = vld [vmem:[%s2095_s1 + $0xa0] ss:$16 sps:$4 sm:$0xff]  }
   0x8   :  { %231 = vmatprep.subr.bf16.mxu0 %v1546_v5  ;;  %271 = vmatpush1.bf16.msra.mxu1 %v1580_v11  ;;  %v1645_v22 = vld [vmem:[%s2095_s1 + $0xc4] ss:$16 sps:$4 sm:$0xff]   ;;  %v1652_v23 = vld [vmem:[%s2095_s1 + $0x88] ss:$16 sps:$4 sm:$0xff]   ;;  %v1658_v24 = vld [vmem:[%s2095_s1 + $0xac] ss:$16 sps:$4 sm:$0xff]  }
   0x9   :  { %272 = vmatprep.subr.bf16.mxu1 %v1597_v14  ;;  %v1664_v25 = vld [vmem:[%s2095_s1 + $0xc0] ss:$16 sps:$4 sm:$0xff]   ;;  %v1670_v26 = vld [vmem:[%s2095_s1 + $0xe4] ss:$16 sps:$4 sm:$0xff]   ;;  %v1676_v27 = vld [vmem:[%s2095_s1 + $0xa8] ss:$16 sps:$4 sm:$0xff]  }
   0xa   :  { %v1682_v28 = vld [vmem:[%s2095_s1 + $0xcc] ss:$16 sps:$4 sm:$0xff]   ;;  %v1688_v29 = vld [vmem:[%s2095_s1 + $0xe0] ss:$16 sps:$4 sm:$0xff]   ;;  %v1695_v30 = vld [vmem:[%s2095_s1 + $0xc8] ss:$16 sps:$4 sm:$0xff]  }
   0xb   :  { %232 = vmatpush1.bf16.msra.mxu0 %v1562_v8  ;;  %v1701_v31 = vld [vmem:[%s2095_s1 + $0xec] ss:$16 sps:$4 sm:$0xff]   ;;  %v1708_v32 = vld [vmem:[%s2095_s1 + $0xe8] ss:$16 sps:$4 sm:$0xff]   ;;  %v28_v34 = vld [vmem:[%s2096_s0] sm:$0xff] }
   0xc   :  { %233 = vmatprep.subr.bf16.mxu0 %v1569_v9  ;;  %273 = vmatpush1.bf16.msra.mxu1 %v1604_v15  ;;  %v30_v35 = vunpack.c.l.bf16 %v28_v34  ;;  %v31_v36 = vunpack.c.h.bf16 %v28_v34  ;;  %v29_v38 = vld [vmem:[%s2096_s0 + $0x8] sm:$0xff] }
   0xd   :  { %274 = vmatprep.subr.bf16.mxu1 %v1610_v16  ;;  %v32_v45 = vunpack.c.l.bf16 %v29_v38  ;;  %v33_v51 = vunpack.c.h.bf16 %v29_v38 }
   0xf   :  { %234 = vmatpush1.bf16.msra.mxu0 %v1587_v12 }
  0x10   :  { %235 = vmatprep.subr.bf16.mxu0 %v1592_v13  ;;  %275 = vmatpush1.bf16.msra.mxu1 %v1628_v19 }
  0x11   :  { %276 = vmatprep.subr.bf16.mxu1 %v1634_v20 }
  0x13   :  { %236 = vmatpush1.bf16.msra.mxu0 %v1616_v17 }
  0x14   :  { %237 = vmatprep.subr.bf16.mxu0 %v1622_v18  ;;  %277 = vmatpush1.bf16.msra.mxu1 %v1652_v23 }
  0x15   :  { %278 = vmatprep.subr.bf16.mxu1 %v1658_v24 }
  0x17   :  { %238 = vmatpush1.bf16.msra.mxu0 %v1640_v21 }
  0x18   :  { %239 = vmatprep.subr.bf16.mxu0 %v1645_v22  ;;  %279 = vmatpush1.bf16.msra.mxu1 %v1676_v27 }
  0x19   :  { %280 = vmatprep.subr.bf16.mxu1 %v1682_v28 }
  0x1b   :  { %240 = vmatpush1.bf16.msra.mxu0 %v1664_v25 }
  0x1c   :  { %241 = vmatprep.subr.bf16.mxu0 %v1670_v26  ;;  %281 = vmatpush1.bf16.msra.mxu1 %v1695_v30 }
  0x1d   :  { %282 = vmatprep.subr.bf16.mxu1 %v1701_v31 }
  0x1f   :  { %242 = vmatpush1.bf16.msra.mxu0 %v1688_v29 }
  0x20   :  { %345 = vmatprep.subr.bf16.mxu0 %v1520_v0  ;;  %283 = vmatpush1.bf16.msra.mxu1 %v1708_v32 }
  0x21   :  { %386 = vmatprep.subr.bf16.mxu1 %v1551_v6 }
  0x22   :  { %260 = vmatmul.mubr.bf16.vlgmr.msra.gmra.mrb[0].mxu0 %v1491_v33 }
  0x23   :  { %346 = vmatpush1.bf16.msra.mxu0 %v1527_v2  ;;  %377 = vmatprep.mubr.bf16.mxu0 %v1490_v1 }
  0x24   :  { %347 = vmatprep.subr.bf16.mxu0 %v1534_v3  ;;  %301 = vmatmul.mubr.bf16.vlgmr.msra.gmra.mrb[0].mxu1 %v1491_v33 }
  0x25   :  { %387 = vmatpush1.bf16.msra.mxu1 %v1556_v7  ;;  %418 = vmatprep.mubr.bf16.mxu1 %v1490_v1 }
  0x26   :  { %388 = vmatprep.subr.bf16.mxu1 %v1575_v10 }
  0x27   :  { %348 = vmatpush1.bf16.msra.mxu0 %v1540_v4 }
  0x28   :  { %349 = vmatprep.subr.bf16.mxu0 %v1546_v5 }
  0x29   :  { %389 = vmatpush1.bf16.msra.mxu1 %v1580_v11 }
  0x2a   :  { %390 = vmatprep.subr.bf16.mxu1 %v1597_v14 }
  0x2b   :  { %350 = vmatpush1.bf16.msra.mxu0 %v1562_v8 }
  0x2c   :  { %351 = vmatprep.subr.bf16.mxu0 %v1569_v9 }
  0x2d   :  { %391 = vmatpush1.bf16.msra.mxu1 %v1604_v15 }
  0x2e   :  { %392 = vmatprep.subr.bf16.mxu1 %v1610_v16 }
  0x2f   :  { %352 = vmatpush1.bf16.msra.mxu0 %v1587_v12 }
  0x30   :  { %353 = vmatprep.subr.bf16.mxu0 %v1592_v13 }
  0x31   :  { %393 = vmatpush1.bf16.msra.mxu1 %v1628_v19 }
  0x32   :  { %394 = vmatprep.subr.bf16.mxu1 %v1634_v20 }
  0x33   :  { %354 = vmatpush1.bf16.msra.mxu0 %v1616_v17 }
  0x34   :  { %355 = vmatprep.subr.bf16.mxu0 %v1622_v18 }
  0x35   :  { %395 = vmatpush1.bf16.msra.mxu1 %v1652_v23 }
  0x36   :  { %396 = vmatprep.subr.bf16.mxu1 %v1658_v24 }
  0x37   :  { %356 = vmatpush1.bf16.msra.mxu0 %v1640_v21 }
  0x38   :  { %357 = vmatprep.subr.bf16.mxu0 %v1645_v22 }
  0x39   :  { %397 = vmatpush1.bf16.msra.mxu1 %v1676_v27 }
  0x3a   :  { %398 = vmatprep.subr.bf16.mxu1 %v1682_v28 }
  0x3b   :  { %358 = vmatpush1.bf16.msra.mxu0 %v1664_v25 }
  0x3c   :  { %359 = vmatprep.subr.bf16.mxu0 %v1670_v26 }
  0x3d   :  { %399 = vmatpush1.bf16.msra.mxu1 %v1695_v30 }
  0x3e   :  { %400 = vmatprep.subr.bf16.mxu1 %v1701_v31 }
  0x3f   :  { %360 = vmatpush1.bf16.msra.mxu0 %v1688_v29 }
  0x40   :  { %463 = vmatprep.subr.bf16.mxu0 %v1520_v0 }
  0x41   :  { %401 = vmatpush1.bf16.msra.mxu1 %v1708_v32 }
  0x42   :  { %504 = vmatprep.subr.bf16.mxu1 %v1551_v6 }
  0xf5   :  { %v261_v37 = vpop.f32.mrb[0].mxu0 }
  0xf6   :  { %v309_v39 = vadd.f32 %v261_v37, %v30_v35  ;;  %v263_v40 = vpop.f32.mrb[1].mxu0 }
  0xf7   :  { %v310_v41 = vadd.f32 %v263_v40, %v31_v36  ;;  %v265_v42 = vpop.f32.mrb[2].mxu0  ;;  %v302_v47 = vpop.f32.mrb[0].mxu1  ;;  %v1237_v40 = vld [vmem:[%s2096_s0 + $0x10] sm:$0xff] }
  0xf8   :  { %v1234_v43 = vmul.f32 -1.442695, %v309_v39  ;;  %v266_v44 = vpop.f32.mrb[3].mxu0  ;;  %v304_v48 = vpop.f32.mrb[1].mxu1  ;;  %v311_v49 = vadd.f32 %v302_v47, %v32_v45  ;;  %v341_v42 = vunpack.c.h.bf16 %v1237_v40 }
  0xf9   :  { %v1235_v46 = vmul.f32 -1.442695, %v310_v41  ;;  %v306_v50 = vpop.f32.mrb[2].mxu1  ;;  %v312_v54 = vadd.f32 %v304_v48, %v33_v51  ;;  %v340_v41 = vunpack.c.l.bf16 %v1237_v40  ;;  %v1238_v48 = vld [vmem:[%s2096_s0 + $0x18] sm:$0xff] }
  0xfa   :  { %1326 = vpow2.f32 %v1234_v43  ;;  %v307_v52 = vpop.f32.mrb[3].mxu1  ;;  %v1236_v53 = vmul.f32 -1.442695, %v311_v49 }
  0xfb   :  { %1328 = vpow2.f32 %v1235_v46 }
  0xfc   :  { %1330 = vpow2.f32 %v1236_v53 }
  0xfd   :  { %1332 = vtanh.f32 %v312_v54 }
 0x104   :  { %v1327_v55 = vpop.eup %1326 }
 0x105   :  { %v1329_v56 = vpop.eup %1328  ;;  %v322_v57 = vadd.f32 1.0, %v1327_v55 }
 0x106   :  { %v323_v58 = vadd.f32 1.0, %v1329_v56  ;;  %v1331_v59 = vpop.eup %1330  ;;  %v342_v56 = vunpack.c.l.bf16 %v1238_v48 }
 0x107   :  { %1334 = vrcp.f32 %v322_v57  ;;  %v1333_v60 = vpop.eup %1332  ;;  %v324_v62 = vadd.f32 1.0, %v1331_v59  ;;  %v343_v57 = vunpack.c.h.bf16 %v1238_v48 }
 0x108   :  { %1336 = vrcp.f32 %v323_v58 }
 0x109   :  { %1338 = vrcp.f32 %v324_v62 }
 0x111   :  { %v1335_v61 = vpop.eup %1334 }
 0x112   :  { %v1337_v63 = vpop.eup %1336  ;;  %v333_v33 = vmul.f32 %v1335_v61, %v1333_v60 }
 0x113   :  { %v332_v34 = vmul.f32 0.0, %v1337_v63  ;;  %v1339_v36 = vpop.eup %1338 }
 0x115   :  { %v1754_v35 = vadd.f32 %v333_v33, %v332_v34 }
 0x117   :  { %1340 = vtanh.f32 %v1754_v35 }
 0x121   :  { %v1341_v37 = vpop.eup %1340 }
 0x122   :  { %v336_v38 = vmul.f32 %v1341_v37, %v1339_v36 }
 0x124   :  { %v344_v39 = vpack.c.bf16 %v336_v38, %v336_v38 }
 0x126   :  { %378 = vmatmul.mubr.bf16.vlgmr.msra.gmra.mrb[4].mxu0 %v344_v39  ;;  %419 = vmatmul.mubr.bf16.vlgmr.msra.gmra.mrb[4].mxu1 %v344_v39 }
 0x127   :  { %464 = vmatpush1.bf16.msra.mxu0 %v1527_v2  ;;  %505 = vmatpush1.bf16.msra.mxu1 %v1556_v7 }
 0x128   :  { %465 = vmatprep.subr.bf16.mxu0 %v1534_v3  ;;  %506 = vmatprep.subr.bf16.mxu1 %v1575_v10 }
 0x129   :  { %495 = vmatprep.mubr.bf16.mxu0 %v1490_v1  ;;  %536 = vmatprep.mubr.bf16.mxu1 %v1490_v1 }
 0x12b   :  { %466 = vmatpush1.bf16.msra.mxu0 %v1540_v4  ;;  %507 = vmatpush1.bf16.msra.mxu1 %v1580_v11 }
 0x12c   :  { %467 = vmatprep.subr.bf16.mxu0 %v1546_v5  ;;  %508 = vmatprep.subr.bf16.mxu1 %v1597_v14 }
 0x12f   :  { %468 = vmatpush1.bf16.msra.mxu0 %v1562_v8  ;;  %509 = vmatpush1.bf16.msra.mxu1 %v1604_v15 }
 0x130   :  { %469 = vmatprep.subr.bf16.mxu0 %v1569_v9  ;;  %510 = vmatprep.subr.bf16.mxu1 %v1610_v16 }
 0x133   :  { %470 = vmatpush1.bf16.msra.mxu0 %v1587_v12  ;;  %511 = vmatpush1.bf16.msra.mxu1 %v1628_v19 }
 0x134   :  { %471 = vmatprep.subr.bf16.mxu0 %v1592_v13  ;;  %512 = vmatprep.subr.bf16.mxu1 %v1634_v20 }
 0x137   :  { %472 = vmatpush1.bf16.msra.mxu0 %v1616_v17  ;;  %513 = vmatpush1.bf16.msra.mxu1 %v1652_v23 }
 0x138   :  { %473 = vmatprep.subr.bf16.mxu0 %v1622_v18  ;;  %514 = vmatprep.subr.bf16.mxu1 %v1658_v24 }
 0x13b   :  { %474 = vmatpush1.bf16.msra.mxu0 %v1640_v21  ;;  %515 = vmatpush1.bf16.msra.mxu1 %v1676_v27 }
 0x13c   :  { %475 = vmatprep.subr.bf16.mxu0 %v1645_v22  ;;  %516 = vmatprep.subr.bf16.mxu1 %v1682_v28 }
 0x13f   :  { %476 = vmatpush1.bf16.msra.mxu0 %v1664_v25  ;;  %517 = vmatpush1.bf16.msra.mxu1 %v1695_v30 }
 0x140   :  { %477 = vmatprep.subr.bf16.mxu0 %v1670_v26  ;;  %518 = vmatprep.subr.bf16.mxu1 %v1701_v31 }
 0x143   :  { %478 = vmatpush1.bf16.msra.mxu0 %v1688_v29  ;;  %519 = vmatpush1.bf16.msra.mxu1 %v1708_v32 }
 0x144   :  { %581 = vmatprep.subr.bf16.mxu0 %v1520_v0  ;;  %622 = vmatprep.subr.bf16.mxu1 %v1551_v6 }
 0x1f9   :  { %v379_v43 = vpop.f32.mrb[4].mxu0  ;;  %v420_v44 = vpop.f32.mrb[4].mxu1 }
 0x1fa   :  { %v427_v45 = vadd.f32 %v379_v43, %v340_v41  ;;  %v381_v46 = vpop.f32.mrb[5].mxu0  ;;  %v422_v47 = vpop.f32.mrb[5].mxu1  ;;  %v429_v58 = vadd.f32 %v420_v44, %v342_v56 }
 0x1fb   :  { %v428_v49 = vadd.f32 %v381_v46, %v341_v42  ;;  %v383_v50 = vpop.f32.mrb[6].mxu0  ;;  %v424_v51 = vpop.f32.mrb[6].mxu1  ;;  %v430_v59 = vadd.f32 %v422_v47, %v343_v57 }
 0x1fc   :  { %v1239_v52 = vmul.f32 -1.442695, %v427_v45  ;;  %v384_v53 = vpop.f32.mrb[7].mxu0  ;;  %v425_v54 = vpop.f32.mrb[7].mxu1  ;;  %v1241_v60 = vmul.f32 -1.442695, %v429_v58 }
 0x1fd   :  { %v1240_v55 = vmul.f32 -1.442695, %v428_v49  ;;  %v1243_v54 = vld [vmem:[%s2096_s0 + $0x28] sm:$0xff] }
 0x1fe   :  { %1342 = vpow2.f32 %v1239_v52 }
 0x1ff   :  { %1344 = vpow2.f32 %v1240_v55 }
 0x200   :  { %1346 = vtanh.f32 %v430_v59 }
 0x201   :  { %1348 = vpow2.f32 %v1241_v60 }
 0x208   :  { %v1343_v61 = vpop.eup %1342 }
 0x209   :  { %v440_v62 = vadd.f32 1.0, %v1343_v61  ;;  %v1345_v63 = vpop.eup %1344 }
 0x20a   :  { %v441_v33 = vadd.f32 1.0, %v1345_v63  ;;  %v1347_v34 = vpop.eup %1346  ;;  %v461_v63 = vunpack.c.h.bf16 %v1243_v54 }
 0x20b   :  { %1350 = vrcp.f32 %v440_v62  ;;  %v1349_v36 = vpop.eup %1348  ;;  %v460_v62 = vunpack.c.l.bf16 %v1243_v54 }
 0x20c   :  { %1352 = vrcp.f32 %v441_v33  ;;  %v442_v40 = vadd.f32 1.0, %v1349_v36 }
 0x20e   :  { %1354 = vrcp.f32 %v442_v40 }
 0x215   :  { %v1351_v37 = vpop.eup %1350 }
 0x216   :  { %v451_v38 = vmul.f32 %v1351_v37, %v1347_v34  ;;  %v1353_v39 = vpop.eup %1352 }
 0x217   :  { %v450_v41 = vmul.f32 %v1353_v39, %v1754_v35  ;;  %v1242_v35 = vld [vmem:[%s2096_s0 + $0x20] sm:$0xff] }
 0x218   :  { %v1355_v43 = vpop.eup %1354  ;;  %v458_v47 = vunpack.c.l.bf16 %v1242_v35  ;;  %v459_v48 = vunpack.c.h.bf16 %v1242_v35 }
 0x219   :  { %v1798_v42 = vadd.f32 %v451_v38, %v450_v41 }
 0x21b   :  { %1356 = vtanh.f32 %v1798_v42 }
 0x225   :  { %v1357_v44 = vpop.eup %1356 }
 0x226   :  { %v454_v45 = vmul.f32 %v1357_v44, %v1355_v43 }
 0x228   :  { %v462_v46 = vpack.c.bf16 %v454_v45, %v454_v45 }
 0x22a   :  { %496 = vmatmul.mubr.bf16.vlgmr.msra.gmra.mrb[8].mxu0 %v462_v46  ;;  %537 = vmatmul.mubr.bf16.vlgmr.msra.gmra.mrb[8].mxu1 %v462_v46 }
 0x22b   :  { %582 = vmatpush1.bf16.msra.mxu0 %v1527_v2  ;;  %623 = vmatpush1.bf16.msra.mxu1 %v1556_v7 }
 0x22c   :  { %583 = vmatprep.subr.bf16.mxu0 %v1534_v3  ;;  %624 = vmatprep.subr.bf16.mxu1 %v1575_v10 }
 0x22d   :  { %613 = vmatprep.mubr.bf16.mxu0 %v1490_v1  ;;  %654 = vmatprep.mubr.bf16.mxu1 %v1490_v1 }
 0x22f   :  { %584 = vmatpush1.bf16.msra.mxu0 %v1540_v4  ;;  %625 = vmatpush1.bf16.msra.mxu1 %v1580_v11 }
 0x230   :  { %585 = vmatprep.subr.bf16.mxu0 %v1546_v5  ;;  %626 = vmatprep.subr.bf16.mxu1 %v1597_v14 }
 0x233   :  { %586 = vmatpush1.bf16.msra.mxu0 %v1562_v8  ;;  %627 = vmatpush1.bf16.msra.mxu1 %v1604_v15 }
 0x234   :  { %587 = vmatprep.subr.bf16.mxu0 %v1569_v9  ;;  %628 = vmatprep.subr.bf16.mxu1 %v1610_v16 }
 0x237   :  { %588 = vmatpush1.bf16.msra.mxu0 %v1587_v12  ;;  %629 = vmatpush1.bf16.msra.mxu1 %v1628_v19 }
 0x238   :  { %589 = vmatprep.subr.bf16.mxu0 %v1592_v13  ;;  %630 = vmatprep.subr.bf16.mxu1 %v1634_v20 }
 0x23b   :  { %590 = vmatpush1.bf16.msra.mxu0 %v1616_v17  ;;  %631 = vmatpush1.bf16.msra.mxu1 %v1652_v23 }
 0x23c   :  { %591 = vmatprep.subr.bf16.mxu0 %v1622_v18  ;;  %632 = vmatprep.subr.bf16.mxu1 %v1658_v24 }
 0x23f   :  { %592 = vmatpush1.bf16.msra.mxu0 %v1640_v21  ;;  %633 = vmatpush1.bf16.msra.mxu1 %v1676_v27 }
 0x240   :  { %593 = vmatprep.subr.bf16.mxu0 %v1645_v22  ;;  %634 = vmatprep.subr.bf16.mxu1 %v1682_v28 }
 0x243   :  { %594 = vmatpush1.bf16.msra.mxu0 %v1664_v25  ;;  %635 = vmatpush1.bf16.msra.mxu1 %v1695_v30 }
 0x244   :  { %595 = vmatprep.subr.bf16.mxu0 %v1670_v26  ;;  %636 = vmatprep.subr.bf16.mxu1 %v1701_v31 }
 0x247   :  { %596 = vmatpush1.bf16.msra.mxu0 %v1688_v29  ;;  %637 = vmatpush1.bf16.msra.mxu1 %v1708_v32 }
 0x248   :  { %699 = vmatprep.subr.bf16.mxu0 %v1520_v0  ;;  %740 = vmatprep.subr.bf16.mxu1 %v1551_v6 }
 0x2fd   :  { %v497_v49 = vpop.f32.mrb[8].mxu0  ;;  %v538_v50 = vpop.f32.mrb[8].mxu1 }
 0x2fe   :  { %v545_v51 = vadd.f32 %v497_v49, %v458_v47  ;;  %v499_v52 = vpop.f32.mrb[9].mxu0  ;;  %v540_v53 = vpop.f32.mrb[9].mxu1  ;;  %v547_v33 = vadd.f32 %v538_v50, %v460_v62 }
 0x2ff   :  { %v546_v55 = vadd.f32 %v499_v52, %v459_v48  ;;  %v501_v56 = vpop.f32.mrb[10].mxu0  ;;  %v542_v57 = vpop.f32.mrb[10].mxu1  ;;  %v548_v34 = vadd.f32 %v540_v53, %v461_v63 }
 0x300   :  { %v1244_v58 = vmul.f32 -1.442695, %v545_v51  ;;  %v502_v59 = vpop.f32.mrb[11].mxu0  ;;  %v543_v60 = vpop.f32.mrb[11].mxu1  ;;  %v1246_v36 = vmul.f32 -1.442695, %v547_v33 }
 0x301   :  { %v1245_v61 = vmul.f32 -1.442695, %v546_v55  ;;  %v1248_v60 = vld [vmem:[%s2096_s0 + $0x38] sm:$0xff] }
 0x302   :  { %1358 = vpow2.f32 %v1244_v58 }
 0x303   :  { %1360 = vpow2.f32 %v1245_v61 }
 0x304   :  { %1362 = vtanh.f32 %v548_v34 }
 0x305   :  { %1364 = vpow2.f32 %v1246_v36 }
 0x30c   :  { %v1359_v37 = vpop.eup %1358 }
 0x30d   :  { %v558_v38 = vadd.f32 1.0, %v1359_v37  ;;  %v1361_v39 = vpop.eup %1360 }
 0x30e   :  { %v559_v40 = vadd.f32 1.0, %v1361_v39  ;;  %v1363_v41 = vpop.eup %1362  ;;  %v579_v39 = vunpack.c.h.bf16 %v1248_v60 }
 0x30f   :  { %1366 = vrcp.f32 %v558_v38  ;;  %v1365_v43 = vpop.eup %1364  ;;  %v578_v38 = vunpack.c.l.bf16 %v1248_v60 }
 0x310   :  { %1368 = vrcp.f32 %v559_v40  ;;  %v560_v35 = vadd.f32 1.0, %v1365_v43 }
 0x312   :  { %1370 = vrcp.f32 %v560_v35 }
 0x319   :  { %v1367_v44 = vpop.eup %1366 }
 0x31a   :  { %v569_v45 = vmul.f32 %v1367_v44, %v1363_v41  ;;  %v1369_v46 = vpop.eup %1368 }
 0x31b   :  { %v568_v47 = vmul.f32 %v1369_v46, %v1798_v42  ;;  %v1247_v42 = vld [vmem:[%s2096_s0 + $0x30] sm:$0xff] }
 0x31c   :  { %v1371_v49 = vpop.eup %1370  ;;  %v576_v53 = vunpack.c.l.bf16 %v1247_v42  ;;  %v577_v54 = vunpack.c.h.bf16 %v1247_v42 }
 0x31d   :  { %v1842_v48 = vadd.f32 %v569_v45, %v568_v47 }
 0x31f   :  { %1372 = vtanh.f32 %v1842_v48 }
 0x329   :  { %v1373_v50 = vpop.eup %1372 }
 0x32a   :  { %v572_v51 = vmul.f32 %v1373_v50, %v1371_v49 }
 0x32c   :  { %v580_v52 = vpack.c.bf16 %v572_v51, %v572_v51 }
 0x32e   :  { %614 = vmatmul.mubr.bf16.vlgmr.msra.gmra.mrb[12].mxu0 %v580_v52  ;;  %655 = vmatmul.mubr.bf16.vlgmr.msra.gmra.mrb[12].mxu1 %v580_v52 }
 0x32f   :  { %700 = vmatpush1.bf16.msra.mxu0 %v1527_v2  ;;  %741 = vmatpush1.bf16.msra.mxu1 %v1556_v7 }
 0x330   :  { %701 = vmatprep.subr.bf16.mxu0 %v1534_v3  ;;  %742 = vmatprep.subr.bf16.mxu1 %v1575_v10 }
 0x331   :  { %731 = vmatprep.mubr.bf16.mxu0 %v1490_v1  ;;  %772 = vmatprep.mubr.bf16.mxu1 %v1490_v1 }
 0x333   :  { %702 = vmatpush1.bf16.msra.mxu0 %v1540_v4  ;;  %743 = vmatpush1.bf16.msra.mxu1 %v1580_v11 }
 0x334   :  { %703 = vmatprep.subr.bf16.mxu0 %v1546_v5  ;;  %744 = vmatprep.subr.bf16.mxu1 %v1597_v14 }
 0x337   :  { %704 = vmatpush1.bf16.msra.mxu0 %v1562_v8  ;;  %745 = vmatpush1.bf16.msra.mxu1 %v1604_v15 }
 0x338   :  { %705 = vmatprep.subr.bf16.mxu0 %v1569_v9  ;;  %746 = vmatprep.subr.bf16.mxu1 %v1610_v16 }
 0x33b   :  { %706 = vmatpush1.bf16.msra.mxu0 %v1587_v12  ;;  %747 = vmatpush1.bf16.msra.mxu1 %v1628_v19 }
 0x33c   :  { %707 = vmatprep.subr.bf16.mxu0 %v1592_v13  ;;  %748 = vmatprep.subr.bf16.mxu1 %v1634_v20 }
 0x33f   :  { %708 = vmatpush1.bf16.msra.mxu0 %v1616_v17  ;;  %749 = vmatpush1.bf16.msra.mxu1 %v1652_v23 }
 0x340   :  { %709 = vmatprep.subr.bf16.mxu0 %v1622_v18  ;;  %750 = vmatprep.subr.bf16.mxu1 %v1658_v24 }
 0x343   :  { %710 = vmatpush1.bf16.msra.mxu0 %v1640_v21  ;;  %751 = vmatpush1.bf16.msra.mxu1 %v1676_v27 }
 0x344   :  { %711 = vmatprep.subr.bf16.mxu0 %v1645_v22  ;;  %752 = vmatprep.subr.bf16.mxu1 %v1682_v28 }
 0x347   :  { %712 = vmatpush1.bf16.msra.mxu0 %v1664_v25  ;;  %753 = vmatpush1.bf16.msra.mxu1 %v1695_v30 }
 0x348   :  { %713 = vmatprep.subr.bf16.mxu0 %v1670_v26  ;;  %754 = vmatprep.subr.bf16.mxu1 %v1701_v31 }
 0x34b   :  { %714 = vmatpush1.bf16.msra.mxu0 %v1688_v29  ;;  %755 = vmatpush1.bf16.msra.mxu1 %v1708_v32 }
 0x34c   :  { %817 = vmatprep.subr.bf16.mxu0 %v1520_v0  ;;  %858 = vmatprep.subr.bf16.mxu1 %v1551_v6 }
 0x401   :  { %v615_v55 = vpop.f32.mrb[12].mxu0  ;;  %v656_v56 = vpop.f32.mrb[12].mxu1 }
 0x402   :  { %v663_v57 = vadd.f32 %v615_v55, %v576_v53  ;;  %v617_v58 = vpop.f32.mrb[13].mxu0  ;;  %v658_v59 = vpop.f32.mrb[13].mxu1  ;;  %v665_v40 = vadd.f32 %v656_v56, %v578_v38 }
 0x403   :  { %v664_v61 = vadd.f32 %v617_v58, %v577_v54  ;;  %v619_v62 = vpop.f32.mrb[14].mxu0  ;;  %v660_v63 = vpop.f32.mrb[14].mxu1  ;;  %v666_v41 = vadd.f32 %v658_v59, %v579_v39 }
 0x404   :  { %v1249_v33 = vmul.f32 -1.442695, %v663_v57  ;;  %v620_v34 = vpop.f32.mrb[15].mxu0  ;;  %v661_v36 = vpop.f32.mrb[15].mxu1  ;;  %v1251_v43 = vmul.f32 -1.442695, %v665_v40 }
 0x405   :  { %v1250_v37 = vmul.f32 -1.442695, %v664_v61  ;;  %v1253_v36 = vld [vmem:[%s2096_s0 + $0x48] sm:$0xff] }
 0x406   :  { %1374 = vpow2.f32 %v1249_v33 }
 0x407   :  { %1376 = vpow2.f32 %v1250_v37 }
 0x408   :  { %1378 = vtanh.f32 %v666_v41 }
 0x409   :  { %1380 = vpow2.f32 %v1251_v43  ;;  %v696_v43 = vunpack.c.l.bf16 %v1253_v36 }
 0x410   :  { %v1375_v44 = vpop.eup %1374 }
 0x411   :  { %v676_v45 = vadd.f32 1.0, %v1375_v44  ;;  %v1377_v46 = vpop.eup %1376  ;;  %v697_v44 = vunpack.c.h.bf16 %v1253_v36 }
 0x412   :  { %v677_v35 = vadd.f32 1.0, %v1377_v46  ;;  %v1379_v47 = vpop.eup %1378 }
 0x413   :  { %1382 = vrcp.f32 %v676_v45  ;;  %v1381_v49 = vpop.eup %1380 }
 0x414   :  { %1384 = vrcp.f32 %v677_v35  ;;  %v678_v42 = vadd.f32 1.0, %v1381_v49 }
 0x416   :  { %1386 = vrcp.f32 %v678_v42 }
 0x41d   :  { %v1383_v50 = vpop.eup %1382 }
 0x41e   :  { %v687_v51 = vmul.f32 %v1383_v50, %v1379_v47  ;;  %v1385_v52 = vpop.eup %1384 }
 0x41f   :  { %v686_v53 = vmul.f32 %v1385_v52, %v1842_v48  ;;  %v1252_v48 = vld [vmem:[%s2096_s0 + $0x40] sm:$0xff] }
 0x420   :  { %v1387_v55 = vpop.eup %1386  ;;  %v694_v59 = vunpack.c.l.bf16 %v1252_v48  ;;  %v695_v60 = vunpack.c.h.bf16 %v1252_v48 }
 0x421   :  { %v1886_v54 = vadd.f32 %v687_v51, %v686_v53 }
 0x423   :  { %1388 = vtanh.f32 %v1886_v54 }
 0x42d   :  { %v1389_v56 = vpop.eup %1388 }
 0x42e   :  { %v690_v57 = vmul.f32 %v1389_v56, %v1387_v55 }
 0x430   :  { %v698_v58 = vpack.c.bf16 %v690_v57, %v690_v57 }
 0x432   :  { %732 = vmatmul.mubr.bf16.vlgmr.msra.gmra.mrb[16].mxu0 %v698_v58  ;;  %773 = vmatmul.mubr.bf16.vlgmr.msra.gmra.mrb[16].mxu1 %v698_v58 }
 0x433   :  { %818 = vmatpush1.bf16.msra.mxu0 %v1527_v2  ;;  %859 = vmatpush1.bf16.msra.mxu1 %v1556_v7 }
 0x434   :  { %819 = vmatprep.subr.bf16.mxu0 %v1534_v3  ;;  %860 = vmatprep.subr.bf16.mxu1 %v1575_v10 }
 0x435   :  { %849 = vmatprep.mubr.bf16.mxu0 %v1490_v1  ;;  %890 = vmatprep.mubr.bf16.mxu1 %v1490_v1 }
 0x437   :  { %820 = vmatpush1.bf16.msra.mxu0 %v1540_v4  ;;  %861 = vmatpush1.bf16.msra.mxu1 %v1580_v11 }
 0x438   :  { %821 = vmatprep.subr.bf16.mxu0 %v1546_v5  ;;  %862 = vmatprep.subr.bf16.mxu1 %v1597_v14 }
 0x43b   :  { %822 = vmatpush1.bf16.msra.mxu0 %v1562_v8  ;;  %863 = vmatpush1.bf16.msra.mxu1 %v1604_v15 }
 0x43c   :  { %823 = vmatprep.subr.bf16.mxu0 %v1569_v9  ;;  %864 = vmatprep.subr.bf16.mxu1 %v1610_v16 }
 0x43f   :  { %824 = vmatpush1.bf16.msra.mxu0 %v1587_v12  ;;  %865 = vmatpush1.bf16.msra.mxu1 %v1628_v19 }
 0x440   :  { %825 = vmatprep.subr.bf16.mxu0 %v1592_v13  ;;  %866 = vmatprep.subr.bf16.mxu1 %v1634_v20 }
 0x443   :  { %826 = vmatpush1.bf16.msra.mxu0 %v1616_v17  ;;  %867 = vmatpush1.bf16.msra.mxu1 %v1652_v23 }
 0x444   :  { %827 = vmatprep.subr.bf16.mxu0 %v1622_v18  ;;  %868 = vmatprep.subr.bf16.mxu1 %v1658_v24 }
 0x447   :  { %828 = vmatpush1.bf16.msra.mxu0 %v1640_v21  ;;  %869 = vmatpush1.bf16.msra.mxu1 %v1676_v27 }
 0x448   :  { %829 = vmatprep.subr.bf16.mxu0 %v1645_v22  ;;  %870 = vmatprep.subr.bf16.mxu1 %v1682_v28 }
 0x44b   :  { %830 = vmatpush1.bf16.msra.mxu0 %v1664_v25  ;;  %871 = vmatpush1.bf16.msra.mxu1 %v1695_v30 }
 0x44c   :  { %831 = vmatprep.subr.bf16.mxu0 %v1670_v26  ;;  %872 = vmatprep.subr.bf16.mxu1 %v1701_v31 }
 0x44f   :  { %832 = vmatpush1.bf16.msra.mxu0 %v1688_v29  ;;  %873 = vmatpush1.bf16.msra.mxu1 %v1708_v32 }
 0x450   :  { %935 = vmatprep.subr.bf16.mxu0 %v1520_v0  ;;  %976 = vmatprep.subr.bf16.mxu1 %v1551_v6 }
 0x505   :  { %v733_v61 = vpop.f32.mrb[16].mxu0  ;;  %v774_v62 = vpop.f32.mrb[16].mxu1 }
 0x506   :  { %v781_v63 = vadd.f32 %v733_v61, %v694_v59  ;;  %v735_v33 = vpop.f32.mrb[17].mxu0  ;;  %v776_v34 = vpop.f32.mrb[17].mxu1  ;;  %v783_v45 = vadd.f32 %v774_v62, %v696_v43  ;;  %v1463_v43 = vld [vmem:[%s2095_s1 + $0x2c] ss:$16 sps:$4 sm:$0xff]  }
 0x507   :  { %v782_v37 = vadd.f32 %v735_v33, %v695_v60  ;;  %v737_v38 = vpop.f32.mrb[18].mxu0  ;;  %v778_v0 = vpop.f32.mrb[18].mxu1  ;;  %v784_v46 = vadd.f32 %v776_v34, %v697_v44  ;;  %v1464_v44 = vld [vmem:[%s2095_s1 + $0x20] ss:$16 sps:$4 sm:$0xff]  }
 0x508   :  { %v1254_v39 = vmul.f32 -1.442695, %v781_v63  ;;  %v738_v6 = vpop.f32.mrb[19].mxu0  ;;  %v779_v40 = vpop.f32.mrb[19].mxu1  ;;  %v1256_v35 = vmul.f32 -1.442695, %v783_v45 }
 0x509   :  { %v1255_v41 = vmul.f32 -1.442695, %v782_v37  ;;  %v1460_v6 = vld [vmem:[%s2095_s1] ss:$16 sps:$4 sm:$0xff]   ;;  %v1461_v40 = vld [vmem:[%s2095_s1 + $0x8] ss:$16 sps:$4 sm:$0xff]  }
 0x50a   :  { %1390 = vpow2.f32 %v1254_v39  ;;  %v1465_v45 = vld [vmem:[%s2095_s1 + $0x28] ss:$16 sps:$4 sm:$0xff]  }
 0x50b   :  { %1392 = vpow2.f32 %v1255_v41  ;;  %v1462_v41 = vld [vmem:[%s2095_s1 + $0x24] ss:$16 sps:$4 sm:$0xff]  }
 0x50c   :  { %1394 = vtanh.f32 %v784_v46  ;;  %v1466_v46 = vld [vmem:[%s2095_s1 + $0x44] ss:$16 sps:$4 sm:$0xff]  }
 0x50d   :  { %1396 = vpow2.f32 %v1256_v35  ;;  %v1467_v35 = vld [vmem:[%s2095_s1 + $0x4c] ss:$16 sps:$4 sm:$0xff]  }
 0x514   :  { %v1391_v47 = vpop.eup %1390 }
 0x515   :  { %v794_v49 = vadd.f32 1.0, %v1391_v47  ;;  %v1393_v50 = vpop.eup %1392  ;;  %v1469_v47 = vld [vmem:[%s2095_s1 + $0x48] ss:$16 sps:$4 sm:$0xff]  }
 0x516   :  { %v795_v51 = vadd.f32 1.0, %v1393_v50  ;;  %v1395_v52 = vpop.eup %1394  ;;  %v1471_v50 = vld [vmem:[%s2095_s1 + $0x6c] ss:$16 sps:$4 sm:$0xff]  }
 0x517   :  { %1398 = vrcp.f32 %v794_v49  ;;  %v1397_v42 = vpop.eup %1396  ;;  %v1470_v49 = vld [vmem:[%s2095_s1 + $0x64] ss:$16 sps:$4 sm:$0xff]  }
 0x518   :  { %1400 = vrcp.f32 %v795_v51  ;;  %v796_v57 = vadd.f32 1.0, %v1397_v42  ;;  %v1472_v51 = vld [vmem:[%s2095_s1 + $0x60] ss:$16 sps:$4 sm:$0xff]   ;;  %v1474_v42 = vld [vmem:[%s2095_s1 + $0x84] ss:$16 sps:$4 sm:$0xff]  }
 0x51a   :  { %1402 = vrcp.f32 %v796_v57  ;;  %v1478_v57 = vld [vmem:[%s2095_s1 + $0xa4] ss:$16 sps:$4 sm:$0xff]  }
 0x521   :  { %v1399_v53 = vpop.eup %1398 }
 0x522   :  { %v805_v55 = vmul.f32 %v1399_v53, %v1395_v52  ;;  %v1401_v56 = vpop.eup %1400  ;;  %v1473_v52 = vld [vmem:[%s2095_s1 + $0x68] ss:$16 sps:$4 sm:$0xff]   ;;  %v1475_v53 = vld [vmem:[%s2095_s1 + $0x8c] ss:$16 sps:$4 sm:$0xff]  }
 0x523   :  { %v804_v58 = vmul.f32 %v1401_v56, %v1886_v54  ;;  %v1477_v56 = vld [vmem:[%s2095_s1 + $0x88] ss:$16 sps:$4 sm:$0xff]  }
 0x524   :  { %v1403_v59 = vpop.eup %1402 }
 0x525   :  { %v1930_v48 = vadd.f32 %v805_v55, %v804_v58  ;;  %v1476_v55 = vld [vmem:[%s2095_s1 + $0x80] ss:$16 sps:$4 sm:$0xff]   ;;  %v1479_v58 = vld [vmem:[%s2095_s1 + $0xac] ss:$16 sps:$4 sm:$0xff]  }
 0x527   :  { %1404 = vtanh.f32 %v1930_v48 }
 0x531   :  { %v1405_v60 = vpop.eup %1404 }
 0x532   :  { %v808_v61 = vmul.f32 %v1405_v60, %v1403_v59  ;;  %v1481_v59 = vld [vmem:[%s2095_s1 + $0xa8] ss:$16 sps:$4 sm:$0xff]   ;;  %v1482_v60 = vld [vmem:[%s2095_s1 + $0xc4] ss:$16 sps:$4 sm:$0xff]  }
 0x534   :  { %v816_v62 = vpack.c.bf16 %v808_v61, %v808_v61  ;;  %v1483_v61 = vld [vmem:[%s2095_s1 + $0xcc] ss:$16 sps:$4 sm:$0xff]  }
 0x536   :  { %850 = vmatmul.mubr.bf16.vlgmr.msra.gmra.mrb[20].mxu0 %v816_v62  ;;  %891 = vmatmul.mubr.bf16.vlgmr.msra.gmra.mrb[20].mxu1 %v816_v62  ;;  %v1484_v62 = vld [vmem:[%s2095_s1 + $0xc0] ss:$16 sps:$4 sm:$0xff]  }
 0x537   :  { %936 = vmatpush1.bf16.msra.mxu0 %v1527_v2  ;;  %977 = vmatpush1.bf16.msra.mxu1 %v1556_v7  ;;  %v1458_v2 = vld [vmem:[%s2095_s1 + $0x4] ss:$16 sps:$4 sm:$0xff]  }
 0x538   :  { %937 = vmatprep.subr.bf16.mxu0 %v1534_v3  ;;  %978 = vmatprep.subr.bf16.mxu1 %v1575_v10  ;;  %v1459_v3 = vld [vmem:[%s2095_s1 + $0xc] ss:$16 sps:$4 sm:$0xff]  }
 0x539   :  { %967 = vmatprep.mubr.bf16.mxu0 %v1490_v1  ;;  %1008 = vmatprep.mubr.bf16.mxu1 %v1490_v1 }
 0x53b   :  { %938 = vmatpush1.bf16.msra.mxu0 %v1540_v4  ;;  %979 = vmatpush1.bf16.msra.mxu1 %v1580_v11  ;;  %v1257_v4 = vld [vmem:[%s2096_s0 + $0x50] sm:$0xff] }
 0x53c   :  { %939 = vmatprep.subr.bf16.mxu0 %v1546_v5  ;;  %980 = vmatprep.subr.bf16.mxu1 %v1597_v14  ;;  %v812_v5 = vunpack.c.l.bf16 %v1257_v4  ;;  %v813_v7 = vunpack.c.h.bf16 %v1257_v4  ;;  %v1487_v4 = vld [vmem:[%s2095_s1 + $0xec] ss:$16 sps:$4 sm:$0xff]  }
 0x53f   :  { %940 = vmatpush1.bf16.msra.mxu0 %v1562_v8  ;;  %981 = vmatpush1.bf16.msra.mxu1 %v1604_v15 }
 0x540   :  { %941 = vmatprep.subr.bf16.mxu0 %v1569_v9  ;;  %982 = vmatprep.subr.bf16.mxu1 %v1610_v16 }
 0x543   :  { %942 = vmatpush1.bf16.msra.mxu0 %v1587_v12  ;;  %983 = vmatpush1.bf16.msra.mxu1 %v1628_v19 }
 0x544   :  { %943 = vmatprep.subr.bf16.mxu0 %v1592_v13  ;;  %984 = vmatprep.subr.bf16.mxu1 %v1634_v20  ;;  %v1258_v13 = vld [vmem:[%s2096_s0 + $0x58] sm:$0xff] }
 0x547   :  { %944 = vmatpush1.bf16.msra.mxu0 %v1616_v17  ;;  %985 = vmatpush1.bf16.msra.mxu1 %v1652_v23 }
 0x548   :  { %945 = vmatprep.subr.bf16.mxu0 %v1622_v18  ;;  %986 = vmatprep.subr.bf16.mxu1 %v1658_v24 }
 0x54b   :  { %946 = vmatpush1.bf16.msra.mxu0 %v1640_v21  ;;  %987 = vmatpush1.bf16.msra.mxu1 %v1676_v27  ;;  %v814_v21 = vunpack.c.l.bf16 %v1258_v13 }
 0x54c   :  { %947 = vmatprep.subr.bf16.mxu0 %v1645_v22  ;;  %988 = vmatprep.subr.bf16.mxu1 %v1682_v28  ;;  %v815_v22 = vunpack.c.h.bf16 %v1258_v13 }
 0x54f   :  { %948 = vmatpush1.bf16.msra.mxu0 %v1664_v25  ;;  %989 = vmatpush1.bf16.msra.mxu1 %v1695_v30 }
 0x550   :  { %949 = vmatprep.subr.bf16.mxu0 %v1670_v26  ;;  %990 = vmatprep.subr.bf16.mxu1 %v1701_v31 }
 0x553   :  { %950 = vmatpush1.bf16.msra.mxu0 %v1688_v29  ;;  %991 = vmatpush1.bf16.msra.mxu1 %v1708_v32 }
 0x554   :  { %1053 = vmatprep.subr.bf16.mxu0 %v1458_v2  ;;  %1094 = vmatprep.subr.bf16.mxu1 %v1459_v3  ;;  %v1485_v2 = vld [vmem:[%s2095_s1 + $0xc8] ss:$16 sps:$4 sm:$0xff]   ;;  %v1486_v3 = vld [vmem:[%s2095_s1 + $0xe4] ss:$16 sps:$4 sm:$0xff]  }
 0x609   :  { %v851_v8 = vpop.f32.mrb[20].mxu0  ;;  %v892_v9 = vpop.f32.mrb[20].mxu1 }
 0x60a   :  { %v899_v10 = vadd.f32 %v851_v8, %v812_v5  ;;  %v853_v11 = vpop.f32.mrb[21].mxu0  ;;  %v894_v12 = vpop.f32.mrb[21].mxu1  ;;  %v901_v23 = vadd.f32 %v892_v9, %v814_v21  ;;  %v1488_v5 = vld [vmem:[%s2095_s1 + $0xe0] ss:$16 sps:$4 sm:$0xff]  }
 0x60b   :  { %v900_v14 = vadd.f32 %v853_v11, %v813_v7  ;;  %v855_v15 = vpop.f32.mrb[22].mxu0  ;;  %v896_v16 = vpop.f32.mrb[22].mxu1  ;;  %v902_v24 = vadd.f32 %v894_v12, %v815_v22  ;;  %v1489_v7 = vld [vmem:[%s2095_s1 + $0xe8] ss:$16 sps:$4 sm:$0xff]   ;;  %v1262_v8 = vld [vmem:[%s2096_s0 + $0x60] sm:$0xff] }
 0x60c   :  { %v1259_v17 = vmul.f32 -1.442695, %v899_v10  ;;  %v856_v18 = vpop.f32.mrb[23].mxu0  ;;  %v897_v19 = vpop.f32.mrb[23].mxu1  ;;  %v1261_v25 = vmul.f32 -1.442695, %v901_v23  ;;  %v930_v9 = vunpack.c.l.bf16 %v1262_v8  ;;  %v931_v10 = vunpack.c.h.bf16 %v1262_v8 }
 0x60d   :  { %v1260_v20 = vmul.f32 -1.442695, %v900_v14  ;;  %v1263_v16 = vld [vmem:[%s2096_s0 + $0x68] sm:$0xff] }
 0x60e   :  { %1406 = vpow2.f32 %v1259_v17 }
 0x60f   :  { %1408 = vpow2.f32 %v1260_v20 }
 0x610   :  { %1410 = vtanh.f32 %v902_v24  ;;  %v932_v24 = vunpack.c.l.bf16 %v1263_v16 }
 0x611   :  { %1412 = vpow2.f32 %v1261_v25  ;;  %v933_v25 = vunpack.c.h.bf16 %v1263_v16 }
 0x618   :  { %v1407_v26 = vpop.eup %1406 }
 0x619   :  { %v912_v27 = vadd.f32 1.0, %v1407_v26  ;;  %v1409_v28 = vpop.eup %1408 }
 0x61a   :  { %v913_v29 = vadd.f32 1.0, %v1409_v28  ;;  %v1411_v30 = vpop.eup %1410 }
 0x61b   :  { %1414 = vrcp.f32 %v912_v27  ;;  %v1413_v31 = vpop.eup %1412 }
 0x61c   :  { %1416 = vrcp.f32 %v913_v29  ;;  %v914_v33 = vadd.f32 1.0, %v1413_v31 }
 0x61e   :  { %1418 = vrcp.f32 %v914_v33 }
 0x625   :  { %v1415_v32 = vpop.eup %1414 }
 0x626   :  { %v923_v54 = vmul.f32 %v1415_v32, %v1411_v30  ;;  %v1417_v63 = vpop.eup %1416 }
 0x627   :  { %v922_v34 = vmul.f32 %v1417_v63, %v1930_v48  ;;  %v1480_v48 = vld [vmem:[%s2095_s1 + $0xa0] ss:$16 sps:$4 sm:$0xff]  }
 0x628   :  { %v1419_v37 = vpop.eup %1418 }
 0x629   :  { %v1978_v36 = vadd.f32 %v923_v54, %v922_v34 }
 0x62b   :  { %1420 = vtanh.f32 %v1978_v36 }
 0x635   :  { %v1421_v38 = vpop.eup %1420 }
 0x636   :  { %v926_v0 = vmul.f32 %v1421_v38, %v1419_v37 }
 0x638   :  { %v934_v39 = vpack.c.bf16 %v926_v0, %v926_v0 }
 0x63a   :  { %968 = vmatmul.mubr.bf16.vlgmr.msra.gmra.mrb[24].mxu0 %v934_v39  ;;  %1009 = vmatmul.mubr.bf16.vlgmr.msra.gmra.mrb[24].mxu1 %v934_v39 }
 0x63b   :  { %1054 = vmatpush1.bf16.msra.mxu0 %v1460_v6  ;;  %1095 = vmatpush1.bf16.msra.mxu1 %v1461_v40 }
 0x63c   :  { %1055 = vmatprep.subr.bf16.mxu0 %v1462_v41  ;;  %1096 = vmatprep.subr.bf16.mxu1 %v1463_v43 }
 0x63d   :  { %1085 = vmatprep.mubr.bf16.mxu0 %v1490_v1  ;;  %1126 = vmatprep.mubr.bf16.mxu1 %v1490_v1  ;;  %v1468_v1 = vld [vmem:[%s2095_s1 + $0x40] ss:$16 sps:$4 sm:$0xff]  }
 0x63f   :  { %1056 = vmatpush1.bf16.msra.mxu0 %v1464_v44  ;;  %1097 = vmatpush1.bf16.msra.mxu1 %v1465_v45  ;;  %v9_v44 = vstv %s2097_s3  ;;  %v1267_v45 = vld [vmem:[%s2096_s0 + $0x70] sm:$0xff] }
 0x640   :  { %1057 = vmatprep.subr.bf16.mxu0 %v1466_v46  ;;  %1098 = vmatprep.subr.bf16.mxu1 %v1467_v35  ;;  %10 = vst [vmem:[#allocation4] sm:$0x1] %v9_v44  ;;  %v1048_v46 = vunpack.c.l.bf16 %v1267_v45 }
 0x643   :  { %1058 = vmatpush1.bf16.msra.mxu0 %v1468_v1  ;;  %1099 = vmatpush1.bf16.msra.mxu1 %v1469_v47 }
 0x644   :  { %1059 = vmatprep.subr.bf16.mxu0 %v1470_v49  ;;  %1100 = vmatprep.subr.bf16.mxu1 %v1471_v50 }
 0x647   :  { %1060 = vmatpush1.bf16.msra.mxu0 %v1472_v51  ;;  %1101 = vmatpush1.bf16.msra.mxu1 %v1473_v52  ;;  %v1268_v51 = vld [vmem:[%s2096_s0 + $0x78] sm:$0xff] }
 0x648   :  { %1061 = vmatprep.subr.bf16.mxu0 %v1474_v42  ;;  %1102 = vmatprep.subr.bf16.mxu1 %v1475_v53 }
 0x64b   :  { %1062 = vmatpush1.bf16.msra.mxu0 %v1476_v55  ;;  %1103 = vmatpush1.bf16.msra.mxu1 %v1477_v56 }
 0x64c   :  { %1063 = vmatprep.subr.bf16.mxu0 %v1478_v57  ;;  %1104 = vmatprep.subr.bf16.mxu1 %v1479_v58 }
 0x64f   :  { %1064 = vmatpush1.bf16.msra.mxu0 %v1480_v48  ;;  %1105 = vmatpush1.bf16.msra.mxu1 %v1481_v59  ;;  %v1050_v48 = vunpack.c.l.bf16 %v1268_v51  ;;  %v1051_v59 = vunpack.c.h.bf16 %v1268_v51 }
 0x650   :  { %1065 = vmatprep.subr.bf16.mxu0 %v1482_v60  ;;  %1106 = vmatprep.subr.bf16.mxu1 %v1483_v61 }
 0x653   :  { %1066 = vmatpush1.bf16.msra.mxu0 %v1484_v62  ;;  %1107 = vmatpush1.bf16.msra.mxu1 %v1485_v2 }
 0x654   :  { %1067 = vmatprep.subr.bf16.mxu0 %v1486_v3  ;;  %1108 = vmatprep.subr.bf16.mxu1 %v1487_v4 }
 0x657   :  { %1068 = vmatpush1.bf16.msra.mxu0 %v1488_v5  ;;  %1109 = vmatpush1.bf16.msra.mxu1 %v1489_v7 }
 0x70d   :  { %v969_v11 = vpop.f32.mrb[24].mxu0  ;;  %v1010_v12 = vpop.f32.mrb[24].mxu1 }
 0x70e   :  { %v1017_v13 = vadd.f32 %v969_v11, %v930_v9  ;;  %v971_v14 = vpop.f32.mrb[25].mxu0  ;;  %v1012_v15 = vpop.f32.mrb[25].mxu1  ;;  %v1019_v26 = vadd.f32 %v1010_v12, %v932_v24 }
 0x70f   :  { %v1018_v17 = vadd.f32 %v971_v14, %v931_v10  ;;  %v973_v18 = vpop.f32.mrb[26].mxu0  ;;  %v1014_v19 = vpop.f32.mrb[26].mxu1  ;;  %v1020_v27 = vadd.f32 %v1012_v15, %v933_v25 }
 0x710   :  { %v1264_v20 = vmul.f32 -1.442695, %v1017_v13  ;;  %v974_v21 = vpop.f32.mrb[27].mxu0  ;;  %v1015_v22 = vpop.f32.mrb[27].mxu1  ;;  %v1266_v28 = vmul.f32 -1.442695, %v1019_v26 }
 0x711   :  { %v1265_v23 = vmul.f32 -1.442695, %v1018_v17  ;;  %v1272_v17 = vld [vmem:[%s2098_s2] ss:$0 sm:$0xff] }
 0x712   :  { %1422 = vpow2.f32 %v1264_v20  ;;  %v1273_v20 = vld [vmem:[#allocation4] ss:$0 sm:$0xff] }
 0x713   :  { %1424 = vpow2.f32 %v1265_v23 }
 0x714   :  { %1426 = vtanh.f32 %v1020_v27 }
 0x715   :  { %1428 = vpow2.f32 %v1266_v28 }
 0x71c   :  { %v1423_v29 = vpop.eup %1422 }
 0x71d   :  { %v1030_v30 = vadd.f32 1.0, %v1423_v29  ;;  %v1425_v31 = vpop.eup %1424 }
 0x71e   :  { %v1031_v32 = vadd.f32 1.0, %v1425_v31  ;;  %v1427_v54 = vpop.eup %1426 }
 0x71f   :  { %1430 = vrcp.f32 %v1030_v30  ;;  %v1429_v63 = vpop.eup %1428 }
 0x720   :  { %1432 = vrcp.f32 %v1031_v32  ;;  %v1032_v38 = vadd.f32 1.0, %v1429_v63 }
 0x722   :  { %1434 = vrcp.f32 %v1032_v38 }
 0x729   :  { %v1431_v33 = vpop.eup %1430 }
 0x72a   :  { %v1041_v34 = vmul.f32 %v1431_v33, %v1427_v54  ;;  %v1433_v37 = vpop.eup %1432 }
 0x72b   :  { %v1040_v0 = vmul.f32 %v1433_v37, %v1978_v36  ;;  %v1049_v36 = vunpack.c.h.bf16 %v1267_v45 }
 0x72c   :  { %v1435_v6 = vpop.eup %1434 }
 0x72d   :  { %v1042_v39 = vadd.f32 %v1041_v34, %v1040_v0 }
 0x72f   :  { %1436 = vtanh.f32 %v1042_v39 }
 0x739   :  { %v1437_v40 = vpop.eup %1436 }
 0x73a   :  { %v1044_v41 = vmul.f32 %v1437_v40, %v1435_v6 }
 0x73c   :  { %v1052_v43 = vpack.c.bf16 %v1044_v41, %v1044_v41 }
 0x73e   :  { %1086 = vmatmul.mubr.bf16.vlgmr.msra.gmra.mrb[28].mxu0 %v1052_v43  ;;  %1127 = vmatmul.mubr.bf16.vlgmr.msra.gmra.mrb[28].mxu1 %v1052_v43 }
 0x811   :  { %v1087_v35 = vpop.f32.mrb[28].mxu0  ;;  %v1128_v1 = vpop.f32.mrb[28].mxu1 }
 0x812   :  { %v1135_v47 = vadd.f32 %v1087_v35, %v1048_v46  ;;  %v1089_v49 = vpop.f32.mrb[29].mxu0  ;;  %v1130_v50 = vpop.f32.mrb[29].mxu1  ;;  %v1137_v60 = vadd.f32 %v1128_v1, %v1050_v48 }
 0x813   :  { %v1136_v52 = vadd.f32 %v1089_v49, %v1049_v36  ;;  %v1091_v42 = vpop.f32.mrb[30].mxu0  ;;  %v1132_v53 = vpop.f32.mrb[30].mxu1  ;;  %v1138_v61 = vadd.f32 %v1130_v50, %v1051_v59 }
 0x814   :  { %v1269_v55 = vmul.f32 -1.442695, %v1135_v47  ;;  %v1092_v56 = vpop.f32.mrb[31].mxu0  ;;  %v1133_v57 = vpop.f32.mrb[31].mxu1  ;;  %v1271_v62 = vmul.f32 -1.442695, %v1137_v60 }
 0x815   :  { %v1270_v58 = vmul.f32 -1.442695, %v1136_v52 }
 0x816   :  { %1438 = vpow2.f32 %v1269_v55 }
 0x817   :  { %1440 = vpow2.f32 %v1270_v58 }
 0x818   :  { %1442 = vtanh.f32 %v1138_v61 }
 0x819   :  { %1444 = vpow2.f32 %v1271_v62 }
 0x820   :  { %v1439_v2 = vpop.eup %1438 }
 0x821   :  { %v1148_v3 = vadd.f32 1.0, %v1439_v2  ;;  %v1441_v4 = vpop.eup %1440 }
 0x822   :  { %v1149_v5 = vadd.f32 1.0, %v1441_v4  ;;  %v1443_v7 = vpop.eup %1442 }
 0x823   :  { %1446 = vrcp.f32 %v1148_v3  ;;  %v1445_v8 = vpop.eup %1444 }
 0x824   :  { %1448 = vrcp.f32 %v1149_v5  ;;  %v1150_v12 = vadd.f32 1.0, %v1445_v8 }
 0x826   :  { %1450 = vrcp.f32 %v1150_v12 }
 0x82d   :  { %v1447_v9 = vpop.eup %1446 }
 0x82e   :  { %v1159_v10 = vmul.f32 %v1447_v9, %v1443_v7  ;;  %v1449_v11 = vpop.eup %1448 }
 0x82f   :  { %v1158_v13 = vmul.f32 %v1449_v11, %v1042_v39 }
 0x830   :  { %v1451_v15 = vpop.eup %1450 }
 0x831   :  { %v1160_v14 = vadd.f32 %v1159_v10, %v1158_v13 }
 0x833   :  { %1452 = vtanh.f32 %v1160_v14 }
 0x83d   :  { %v1453_v16 = vpop.eup %1452 }
 0x83e   :  { %v1162_v18 = vmul.f32 %v1453_v16, %v1451_v15 }
 0x840   :  { %v1175_v19 = vmul.f32 %v1272_v17, %v1162_v18 }
 0x842   :  { %1176 = vadd.xlane.f32.xlu0 %v1175_v19 }
 0x8cf   :  { %v1177_v21 = vpop.xlane.xlu0 %1176 }
 0x8d0   :  { %v1185_v22 = vadd.f32 %v1273_v20, %v1177_v21 }
 0x8d2   :  { %v1274_v23 = vmul.f32 -1.442695, %v1185_v22 }
 0x8d4   :  { %1454 = vpow2.f32 %v1274_v23 }
 0x8de   :  { %v1455_v24 = vpop.eup %1454 }
 0x8df   :  { %v1189_v25 = vadd.f32 1.0, %v1455_v24 }
 0x8e1   :  { %1456 = vrcp.f32 %v1189_v25 }
 0x8eb   :  { %v1457_v26 = vpop.eup %1456 }
 0x8ec   :  { %1194 = vperm.xlu0 %1277, %v1457_v26  }
 0x96b   :  { %v1195_v27 = vpop.permute.xlu0 %1194 }
 0x96c   :  { %1197 = vst [vmem:[%s2099_s4] sm:$0xff] %v1195_v27 }

</bundles_post_ra>
